<compile_context>
chip_gen: v6e
topology: v6e:2x2x1
jax: 0.10.0
libtpu: 0.0.40
codegen_flags: <defaults>
</compile_context>

<pallas_src>
import functools
import math

import jax
import jax.numpy as jnp
from jax.experimental import pallas as pl
from jax.experimental.pallas import tpu as pltpu


def _encoder_kernel(y_ref, kv_ref, wq_ref, wk_ref, wv_ref, wo_ref,
                    g_ref, b_ref, o_ref, acc_ref, *,
                    num_heads, scale, eps):
    """One (layer, head) grid step of the fused transformer encoder."""
    layer = pl.program_id(0)
    head = pl.program_id(1)

    # Load the encoder input into the resident output buffer once; it then
    # carries Y across layers entirely in VMEM.
    @pl.when((layer == 0) & (head == 0))
    def _():
        o_ref[...] = y_ref[...].astype(o_ref.dtype)

    # Start of a layer's head loop: reset the attention-output accumulator.
    @pl.when(head == 0)
    def _():
        acc_ref[...] = jnp.zeros_like(acc_ref)

    y = o_ref[...]                              # (Lq, Dq)  current layer input
    kv = kv_ref[...].astype(jnp.float32)        # (Lk, Dkv) keys == values

    # Per-head projections (exact per-head column slices of W_q/W_k/W_v).
    q = jnp.dot(y, wq_ref[...], preferred_element_type=jnp.float32)    # (Lq, dh)
    k = jnp.dot(kv, wk_ref[...], preferred_element_type=jnp.float32)   # (Lk, dh)
    v = jnp.dot(kv, wv_ref[...], preferred_element_type=jnp.float32)   # (Lk, dhv)

    # Scaled dot-product attention (dropout is identity at inference).
    s = jax.lax.dot_general(q, k, (((1,), (1,)), ((), ())),
                            preferred_element_type=jnp.float32) * scale  # (Lq, Lk)
    s_max = jnp.max(s, axis=-1, keepdims=True)
    p = jnp.exp(s - s_max)
    attn = p / jnp.sum(p, axis=-1, keepdims=True)
    ctx = jnp.dot(attn, v, preferred_element_type=jnp.float32)           # (Lq, dhv)

    # Per-head slice of W_o, accumulated over heads == concat(heads) @ W_o.
    acc_ref[...] += jnp.dot(ctx, wo_ref[...], preferred_element_type=jnp.float32)

    # End of the head loop: residual add + LayerNorm, update carried Y.
    @pl.when(head == num_heads - 1)
    def _():
        x = acc_ref[...] + y
        mean = jnp.mean(x, axis=-1, keepdims=True)
        var = jnp.mean(jnp.square(x - mean), axis=-1, keepdims=True)
        xn = (x - mean) * jax.lax.rsqrt(var + eps)
        o_ref[...] = xn * g_ref[...] + b_ref[...]


def transformer_encoder_forward(p_feat, d_feat, wq, wk, wv, wo, gamma, beta,
                                *, num_heads, eps=1e-5):
    """Fused forward of the PyTorch TransformerEncoder (inference mode).

    p_feat : (Lq, Dq)       queries (q_in_dim = Dq)
    d_feat : (Lk, Dkv)      keys == values (kv_in_dim = Dkv)
    wq     : (L, Dq,  query_size)   per-layer W_q, laid out so that y @ wq[l]
    wk     : (L, Dkv, key_size)
    wv     : (L, Dkv, value_size)
    wo     : (L, value_size, Dq)
    gamma, beta : (L, Dq)   LayerNorm affine parameters
    """
    Lq, Dq = p_feat.shape
    Lk, Dkv = d_feat.shape
    L = wq.shape[0]
    qs, ks, vs = wq.shape[2], wk.shape[2], wv.shape[2]
    assert qs % num_heads == 0 and ks % num_heads == 0 and vs % num_heads == 0
    dh, dhk, dhv = qs // num_heads, ks // num_heads, vs // num_heads
    assert dh == dhk, "query/key head dims must match"
    assert wo.shape == (L, vs, Dq)

    # Split heads once in the wrapper: (L, H, in_dim, head_dim) weight slabs so
    # the kernel never reshapes or slices along the lane dimension.
    wq_h = wq.reshape(L, Dq, num_heads, dh).transpose(0, 2, 1, 3)
    wk_h = wk.reshape(L, Dkv, num_heads, dhk).transpose(0, 2, 1, 3)
    wv_h = wv.reshape(L, Dkv, num_heads, dhv).transpose(0, 2, 1, 3)
    wo_h = wo.reshape(L, num_heads, dhv, Dq)
    gamma2 = gamma.reshape(L, 1, Dq)
    beta2 = beta.reshape(L, 1, Dq)

    kernel = functools.partial(
        _encoder_kernel,
        num_heads=num_heads,
        scale=1.0 / math.sqrt(dh),
        eps=eps,
    )

    full2d = lambda l, h: (0, 0)

    flops = 2 * L * (Lq * Dq * qs + Lk * Dkv * (ks + vs)
                     + num_heads * Lq * Lk * (dh + dhv) + Lq * vs * Dq)
    bytes_accessed = 4 * (p_feat.size + d_feat.size + wq.size + wk.size
                          + wv.size + wo.size + gamma.size + beta.size
                          + Lq * Dq)

    return pl.pallas_call(
        kernel,
        out_shape=jax.ShapeDtypeStruct((Lq, Dq), jnp.float32),
        grid_spec=pltpu.PrefetchScalarGridSpec(
            num_scalar_prefetch=0,
            grid=(L, num_heads),
            in_specs=[
                pl.BlockSpec((Lq, Dq), full2d),                              # p_feat
                pl.BlockSpec((Lk, Dkv), full2d),                             # d_feat
                pl.BlockSpec((None, None, Dq, dh), lambda l, h: (l, h, 0, 0)),   # W_q head
                pl.BlockSpec((None, None, Dkv, dhk), lambda l, h: (l, h, 0, 0)),  # W_k head
                pl.BlockSpec((None, None, Dkv, dhv), lambda l, h: (l, h, 0, 0)),  # W_v head
                pl.BlockSpec((None, None, dhv, Dq), lambda l, h: (l, h, 0, 0)),   # W_o head
                pl.BlockSpec((None, 1, Dq), lambda l, h: (l, 0, 0)),          # LN gamma
                pl.BlockSpec((None, 1, Dq), lambda l, h: (l, 0, 0)),          # LN beta
            ],
            out_specs=pl.BlockSpec((Lq, Dq), full2d),
            scratch_shapes=[pltpu.VMEM((Lq, Dq), jnp.float32)],
        ),
        compiler_params=pltpu.CompilerParams(
            # Heads accumulate into a shared buffer and layers are sequential.
            dimension_semantics=("arbitrary", "arbitrary"),
        ),
        cost_estimate=pl.CostEstimate(
            flops=flops,
            transcendentals=L * (num_heads * Lq * Lk + Lq),
            bytes_accessed=bytes_accessed,
        ),
    )(p_feat, d_feat, wq_h, wk_h, wv_h, wo_h, gamma2, beta2)


def _reference_forward(p_feat, d_feat, wq, wk, wv, wo, gamma, beta, num_heads,
                       eps=1e-5):
    """Pure-JAX mirror of the PyTorch module (eval mode)."""
    y = p_feat
    for l in range(wq.shape[0]):
        Q = y @ wq[l]
        K = d_feat @ wk[l]
        V = d_feat @ wv[l]

        def split(x):  # transpose_qkv
            return x.reshape(x.shape[0], num_heads, -1).transpose(1, 0, 2)

        Qh, Kh, Vh = split(Q), split(K), split(V)
        d = Qh.shape[-1]
        scores = jnp.einsum("hqd,hkd->hqk", Qh, Kh) / math.sqrt(d)
        attn = jax.nn.softmax(scores, axis=-1)
        ctx = jnp.einsum("hqk,hkd->hqd", attn, Vh)
        concat = ctx.transpose(1, 0, 2).reshape(ctx.shape[1], -1)  # transpose_output
        attn_out = concat @ wo[l]
        x = attn_out + y                      # dropout == identity in eval
        mean = x.mean(-1, keepdims=True)
        var = jnp.mean((x - mean) ** 2, axis=-1, keepdims=True)
        y = (x - mean) / jnp.sqrt(var + eps) * gamma[l] + beta[l]
    return y


if __name__ == "__main__":
    # Full f32 matmul precision so the XLA reference matches the kernel closely.
    jax.config.update("jax_default_matmul_precision", "highest")

    key = jax.random.PRNGKey(0)
    keys = jax.random.split(key, 8)

    # Small shapes consistent with the module: Lq proteins, Lk drugs, hidden 32.
    Lq, Lk = 48, 40
    Dq, Dkv = 32, 32            # q_in_dim, kv_in_dim
    qs = ks = vs = 32           # query/key/value sizes
    H = 4                       # num_heads
    L = 2                       # num_layers

    sw = 1.0 / math.sqrt(Dq)
    p_feat = jax.random.normal(keys[0], (Lq, Dq), dtype=jnp.float32)
    d_feat = jax.random.normal(keys[1], (Lk, Dkv), dtype=jnp.float32)
    wq = jax.random.normal(keys[2], (L, Dq, qs), dtype=jnp.float32) * sw
    wk = jax.random.normal(keys[3], (L, Dkv, ks), dtype=jnp.float32) * sw
    wv = jax.random.normal(keys[4], (L, Dkv, vs), dtype=jnp.float32) * sw
    wo = jax.random.normal(keys[5], (L, vs, Dq), dtype=jnp.float32) * sw
    gamma = 1.0 + 0.1 * jax.random.normal(keys[6], (L, Dq), dtype=jnp.float32)
    beta = 0.1 * jax.random.normal(keys[7], (L, Dq), dtype=jnp.float32)

    out = transformer_encoder_forward(p_feat, d_feat, wq, wk, wv, wo,
                                      gamma, beta, num_heads=H)
    jax.block_until_ready(out)

    ref = _reference_forward(p_feat, d_feat, wq, wk, wv, wo, gamma, beta, H)
    assert out.shape == (Lq, Dq)
    max_err = float(jnp.max(jnp.abs(out - ref)))
    assert jnp.allclose(out, ref, atol=2e-3, rtol=2e-3), f"max_err={max_err}"

    # TODO(synk): dropout is treated as identity (inference mode); the
    # attention_weights attribute side-effect is not materialized.
    print("KERNEL_OK")
</pallas_src>

<mosaic_0001>
module attributes {stable_mosaic.version = 11 : i64} {
  func.func @_encoder_kernel(%arg0: i32, %arg1: i32, %arg2: memref<48x32xf32, #tpu.memory_space<vmem>>, %arg3: memref<40x32xf32, #tpu.memory_space<vmem>>, %arg4: memref<1x1x32x8xf32, #tpu.memory_space<vmem>>, %arg5: memref<1x1x32x8xf32, #tpu.memory_space<vmem>>, %arg6: memref<1x1x32x8xf32, #tpu.memory_space<vmem>>, %arg7: memref<1x1x8x32xf32, #tpu.memory_space<vmem>>, %arg8: memref<1x1x32xf32, #tpu.memory_space<vmem>>, %arg9: memref<1x1x32xf32, #tpu.memory_space<vmem>>, %arg10: memref<48x32xf32, #tpu.memory_space<vmem>>, %arg11: memref<48x32xf32, #tpu.memory_space<vmem>>) attributes {dimension_semantics = [#tpu.dimension_semantics<arbitrary>, #tpu.dimension_semantics<arbitrary>], iteration_bounds = array<i64: 2, 4>, scalar_prefetch = 0 : i64, scratch_operands = 1 : i64, tpu.core_type = #tpu.core_type<tc>, window_params = [{pipeline_mode = #tpu.pipeline_mode<synchronous>, transform_indices = @transform_0, window_bounds = array<i64: 48, 32>}, {pipeline_mode = #tpu.pipeline_mode<synchronous>, transform_indices = @transform_1, window_bounds = array<i64: 40, 32>}, {transform_indices = @transform_2, window_bounds = array<i64: 1, 1, 32, 8>}, {transform_indices = @transform_3, window_bounds = array<i64: 1, 1, 32, 8>}, {transform_indices = @transform_4, window_bounds = array<i64: 1, 1, 32, 8>}, {transform_indices = @transform_5, window_bounds = array<i64: 1, 1, 8, 32>}, {transform_indices = @transform_6, window_bounds = array<i64: 1, 1, 32>}, {transform_indices = @transform_7, window_bounds = array<i64: 1, 1, 32>}, {pipeline_mode = #tpu.pipeline_mode<synchronous>, transform_indices = @transform_8, window_bounds = array<i64: 48, 32>}]} {
    %c0_i32 = arith.constant 0 : i32
    %0 = arith.cmpi eq, %arg0, %c0_i32 : i32
    %c0_i32_0 = arith.constant 0 : i32
    %1 = arith.cmpi eq, %arg1, %c0_i32_0 : i32
    %2 = arith.andi %0, %1 : i1
    %3 = arith.extui %2 : i1 to i32
    %c0_i32_1 = arith.constant 0 : i32
    %4 = arith.cmpi ne, %3, %c0_i32_1 : i32
    scf.if %4 {
      %c0_36 = arith.constant 0 : index
      %c0_37 = arith.constant 0 : index
      %41 = vector.load %arg2[%c0_36, %c0_37] : memref<48x32xf32, #tpu.memory_space<vmem>>, vector<48x32xf32>
      %c0_38 = arith.constant 0 : index
      %c0_39 = arith.constant 0 : index
      %42 = vector.load %arg10[%c0_38, %c0_39] : memref<48x32xf32, #tpu.memory_space<vmem>>, vector<48x32xf32>
      tpu.vector_store %arg10[%c0_38, %c0_39], %41 {strides = array<i32>} : memref<48x32xf32, #tpu.memory_space<vmem>>, vector<48x32xf32>,
    } else {
    }
    %c0_i32_2 = arith.constant 0 : i32
    %5 = arith.cmpi eq, %arg1, %c0_i32_2 : i32
    %6 = arith.extui %5 : i1 to i32
    %c0_i32_3 = arith.constant 0 : i32
    %7 = arith.cmpi ne, %6, %c0_i32_3 : i32
    scf.if %7 {
      %cst_36 = arith.constant 0.000000e+00 : f32
      %41 = vector.broadcast %cst_36 : f32 to vector<48x32xf32>
      %c0_37 = arith.constant 0 : index
      %c0_38 = arith.constant 0 : index
      %42 = vector.load %arg11[%c0_37, %c0_38] : memref<48x32xf32, #tpu.memory_space<vmem>>, vector<48x32xf32>
      tpu.vector_store %arg11[%c0_37, %c0_38], %41 {strides = array<i32>} : memref<48x32xf32, #tpu.memory_space<vmem>>, vector<48x32xf32>,
    } else {
    }
    %c0 = arith.constant 0 : index
    %c0_4 = arith.constant 0 : index
    %8 = vector.load %arg10[%c0, %c0_4] : memref<48x32xf32, #tpu.memory_space<vmem>>, vector<48x32xf32>
    %c0_5 = arith.constant 0 : index
    %c0_6 = arith.constant 0 : index
    %9 = vector.load %arg3[%c0_5, %c0_6] : memref<40x32xf32, #tpu.memory_space<vmem>>, vector<40x32xf32>
    %c0_7 = arith.constant 0 : index
    %c0_8 = arith.constant 0 : index
    %c0_9 = arith.constant 0 : index
    %c0_10 = arith.constant 0 : index
    %10 = vector.load %arg4[%c0_7, %c0_8, %c0_9, %c0_10] : memref<1x1x32x8xf32, #tpu.memory_space<vmem>>, vector<1x1x32x8xf32>
    %11 = vector.shape_cast %10 : vector<1x1x32x8xf32> to vector<32x8xf32>
    %cst = arith.constant dense<0.000000e+00> : vector<48x8xf32>
    %12 = tpu.matmul %8, %11, %cst {dimension_numbers = #tpu.dot_dimension_numbers<[1], [0], [0], [1], [0, 0, 1, 1], [], []>, precision = #tpu.contract_precision<fp32>} : vector<48x32xf32>, vector<32x8xf32>, vector<48x8xf32> -> vector<48x8xf32>
    %c0_11 = arith.constant 0 : index
    %c0_12 = arith.constant 0 : index
    %c0_13 = arith.constant 0 : index
    %c0_14 = arith.constant 0 : index
    %13 = vector.load %arg5[%c0_11, %c0_12, %c0_13, %c0_14] : memref<1x1x32x8xf32, #tpu.memory_space<vmem>>, vector<1x1x32x8xf32>
    %14 = vector.shape_cast %13 : vector<1x1x32x8xf32> to vector<32x8xf32>
    %cst_15 = arith.constant dense<0.000000e+00> : vector<40x8xf32>
    %15 = tpu.matmul %9, %14, %cst_15 {dimension_numbers = #tpu.dot_dimension_numbers<[1], [0], [0], [1], [0, 0, 1, 1], [], []>, precision = #tpu.contract_precision<fp32>} : vector<40x32xf32>, vector<32x8xf32>, vector<40x8xf32> -> vector<40x8xf32>
    %c0_16 = arith.constant 0 : index
    %c0_17 = arith.constant 0 : index
    %c0_18 = arith.constant 0 : index
    %c0_19 = arith.constant 0 : index
    %16 = vector.load %arg6[%c0_16, %c0_17, %c0_18, %c0_19] : memref<1x1x32x8xf32, #tpu.memory_space<vmem>>, vector<1x1x32x8xf32>
    %17 = vector.shape_cast %16 : vector<1x1x32x8xf32> to vector<32x8xf32>
    %cst_20 = arith.constant dense<0.000000e+00> : vector<40x8xf32>
    %18 = tpu.matmul %9, %17, %cst_20 {dimension_numbers = #tpu.dot_dimension_numbers<[1], [0], [0], [1], [0, 0, 1, 1], [], []>, precision = #tpu.contract_precision<fp32>} : vector<40x32xf32>, vector<32x8xf32>, vector<40x8xf32> -> vector<40x8xf32>
    %cst_21 = arith.constant dense<0.000000e+00> : vector<48x40xf32>
    %19 = tpu.matmul %12, %15, %cst_21 {dimension_numbers = #tpu.dot_dimension_numbers<[1], [1], [0], [0], [0, 0, 1, 0], [], []>, precision = #tpu.contract_precision<fp32>} : vector<48x8xf32>, vector<40x8xf32>, vector<48x40xf32> -> vector<48x40xf32>
    %cst_22 = arith.constant 0.353553385 : f32
    %20 = vector.broadcast %cst_22 : f32 to vector<48x40xf32>
    %21 = arith.mulf %19, %20 : vector<48x40xf32>
    %cst_23 = arith.constant dense<0xFF800000> : vector<48xf32>
    %22 = vector.multi_reduction <maximumf>, %21, %cst_23 [1] : vector<48x40xf32> to vector<48xf32>
    %23 = vector.shape_cast %22 : vector<48xf32> to vector<48x1xf32>
    %24 = vector.broadcast %23 : vector<48x1xf32> to vector<48x40xf32>
    %25 = arith.subf %21, %24 : vector<48x40xf32>
    %26 = math.exp %25 : vector<48x40xf32>
    %cst_24 = arith.constant dense<0.000000e+00> : vector<48xf32>
    %27 = vector.multi_reduction <add>, %26, %cst_24 [1] : vector<48x40xf32> to vector<48xf32>
    %28 = vector.shape_cast %27 : vector<48xf32> to vector<48x1xf32>
    %29 = vector.broadcast %28 : vector<48x1xf32> to vector<48x40xf32>
    %30 = arith.divf %26, %29 : vector<48x40xf32>
    %cst_25 = arith.constant dense<0.000000e+00> : vector<48x8xf32>
    %31 = tpu.matmul %30, %18, %cst_25 {dimension_numbers = #tpu.dot_dimension_numbers<[1], [0], [0], [1], [0, 0, 1, 1], [], []>, precision = #tpu.contract_precision<fp32>} : vector<48x40xf32>, vector<40x8xf32>, vector<48x8xf32> -> vector<48x8xf32>
    %c0_26 = arith.constant 0 : index
    %c0_27 = arith.constant 0 : index
    %32 = vector.load %arg11[%c0_26, %c0_27] : memref<48x32xf32, #tpu.memory_space<vmem>>, vector<48x32xf32>
    %c0_28 = arith.constant 0 : index
    %c0_29 = arith.constant 0 : index
    %c0_30 = arith.constant 0 : index
    %c0_31 = arith.constant 0 : index
    %33 = vector.load %arg7[%c0_28, %c0_29, %c0_30, %c0_31] : memref<1x1x8x32xf32, #tpu.memory_space<vmem>>, vector<1x1x8x32xf32>
    %34 = vector.shape_cast %33 : vector<1x1x8x32xf32> to vector<8x32xf32>
    %cst_32 = arith.constant dense<0.000000e+00> : vector<48x32xf32>
    %35 = tpu.matmul %31, %34, %cst_32 {dimension_numbers = #tpu.dot_dimension_numbers<[1], [0], [0], [1], [0, 0, 1, 1], [], []>, precision = #tpu.contract_precision<fp32>} : vector<48x8xf32>, vector<8x32xf32>, vector<48x32xf32> -> vector<48x32xf32>
    %36 = arith.addf %32, %35 : vector<48x32xf32>
    %c0_33 = arith.constant 0 : index
    %c0_34 = arith.constant 0 : index
    %37 = vector.load %arg11[%c0_33, %c0_34] : memref<48x32xf32, #tpu.memory_space<vmem>>, vector<48x32xf32>
    tpu.vector_store %arg11[%c0_33, %c0_34], %36 {strides = array<i32>} : memref<48x32xf32, #tpu.memory_space<vmem>>, vector<48x32xf32>,
    %c3_i32 = arith.constant 3 : i32
    %38 = arith.cmpi eq, %arg1, %c3_i32 : i32
    %39 = arith.extui %38 : i1 to i32
    %c0_i32_35 = arith.constant 0 : i32
    %40 = arith.cmpi ne, %39, %c0_i32_35 : i32
    scf.if %40 {
      %c0_36 = arith.constant 0 : index
      %c0_37 = arith.constant 0 : index
      %41 = vector.load %arg11[%c0_36, %c0_37] : memref<48x32xf32, #tpu.memory_space<vmem>>, vector<48x32xf32>
      %42 = arith.addf %41, %8 : vector<48x32xf32>
      %cst_38 = arith.constant dense<0.000000e+00> : vector<48xf32>
      %43 = vector.multi_reduction <add>, %42, %cst_38 [1] : vector<48x32xf32> to vector<48xf32>
      %44 = vector.shape_cast %43 : vector<48xf32> to vector<48x1xf32>
      %cst_39 = arith.constant 3.200000e+01 : f32
      %45 = vector.broadcast %cst_39 : f32 to vector<48x1xf32>
      %46 = arith.divf %44, %45 : vector<48x1xf32>
      %47 = vector.broadcast %46 : vector<48x1xf32> to vector<48x32xf32>
      %48 = arith.subf %42, %47 : vector<48x32xf32>
      %49 = arith.mulf %48, %48 : vector<48x32xf32>
      %cst_40 = arith.constant dense<0.000000e+00> : vector<48xf32>
      %50 = vector.multi_reduction <add>, %49, %cst_40 [1] : vector<48x32xf32> to vector<48xf32>
      %51 = vector.shape_cast %50 : vector<48xf32> to vector<48x1xf32>
      %cst_41 = arith.constant 3.200000e+01 : f32
      %52 = vector.broadcast %cst_41 : f32 to vector<48x1xf32>
      %53 = arith.divf %51, %52 : vector<48x1xf32>
      %54 = vector.broadcast %46 : vector<48x1xf32> to vector<48x32xf32>
      %55 = arith.subf %42, %54 : vector<48x32xf32>
      %cst_42 = arith.constant 9.99999974E-6 : f32
      %56 = vector.broadcast %cst_42 : f32 to vector<48x1xf32>
      %57 = arith.addf %53, %56 : vector<48x1xf32>
      %58 = math.rsqrt %57 : vector<48x1xf32>
      %59 = vector.broadcast %58 : vector<48x1xf32> to vector<48x32xf32>
      %60 = arith.mulf %55, %59 : vector<48x32xf32>
      %c0_43 = arith.constant 0 : index
      %c0_44 = arith.constant 0 : index
      %c0_45 = arith.constant 0 : index
      %61 = vector.load %arg8[%c0_43, %c0_44, %c0_45] : memref<1x1x32xf32, #tpu.memory_space<vmem>>, vector<1x1x32xf32>
      %62 = vector.shape_cast %61 : vector<1x1x32xf32> to vector<1x32xf32>
      %63 = vector.broadcast %62 : vector<1x32xf32> to vector<48x32xf32>
      %64 = arith.mulf %60, %63 : vector<48x32xf32>
      %c0_46 = arith.constant 0 : index
      %c0_47 = arith.constant 0 : index
      %c0_48 = arith.constant 0 : index
      %65 = vector.load %arg9[%c0_46, %c0_47, %c0_48] : memref<1x1x32xf32, #tpu.memory_space<vmem>>, vector<1x1x32xf32>
      %66 = vector.shape_cast %65 : vector<1x1x32xf32> to vector<1x32xf32>
      %67 = vector.broadcast %66 : vector<1x32xf32> to vector<48x32xf32>
      %68 = arith.addf %64, %67 : vector<48x32xf32>
      %c0_49 = arith.constant 0 : index
      %c0_50 = arith.constant 0 : index
      %69 = vector.load %arg10[%c0_49, %c0_50] : memref<48x32xf32, #tpu.memory_space<vmem>>, vector<48x32xf32>
      tpu.vector_store %arg10[%c0_49, %c0_50], %68 {strides = array<i32>} : memref<48x32xf32, #tpu.memory_space<vmem>>, vector<48x32xf32>,
    } else {
    }
    return
  }
  func.func @transform_0(%arg0: i32, %arg1: i32) -> (i32, i32) {
    %c0_i32 = arith.constant 0 : i32
    %c0_i32_0 = arith.constant 0 : i32
    %c0_i32_1 = arith.constant 0 : i32
    return %c0_i32, %c0_i32_0 : i32, i32
  }
  func.func @transform_1(%arg0: i32, %arg1: i32) -> (i32, i32) {
    %c0_i32 = arith.constant 0 : i32
    %c0_i32_0 = arith.constant 0 : i32
    %c0_i32_1 = arith.constant 0 : i32
    return %c0_i32, %c0_i32_0 : i32, i32
  }
  func.func @transform_2(%arg0: i32, %arg1: i32) -> (i32, i32, i32, i32) {
    %c0_i32 = arith.constant 0 : i32
    %c0_i32_0 = arith.constant 0 : i32
    %c0_i32_1 = arith.constant 0 : i32
    return %arg0, %arg1, %c0_i32, %c0_i32_0 : i32, i32, i32, i32
  }
  func.func @transform_3(%arg0: i32, %arg1: i32) -> (i32, i32, i32, i32) {
    %c0_i32 = arith.constant 0 : i32
    %c0_i32_0 = arith.constant 0 : i32
    %c0_i32_1 = arith.constant 0 : i32
    return %arg0, %arg1, %c0_i32, %c0_i32_0 : i32, i32, i32, i32
  }
  func.func @transform_4(%arg0: i32, %arg1: i32) -> (i32, i32, i32, i32) {
    %c0_i32 = arith.constant 0 : i32
    %c0_i32_0 = arith.constant 0 : i32
    %c0_i32_1 = arith.constant 0 : i32
    return %arg0, %arg1, %c0_i32, %c0_i32_0 : i32, i32, i32, i32
  }
  func.func @transform_5(%arg0: i32, %arg1: i32) -> (i32, i32, i32, i32) {
    %c0_i32 = arith.constant 0 : i32
    %c0_i32_0 = arith.constant 0 : i32
    %c0_i32_1 = arith.constant 0 : i32
    return %arg0, %arg1, %c0_i32, %c0_i32_0 : i32, i32, i32, i32
  }
  func.func @transform_6(%arg0: i32, %arg1: i32) -> (i32, i32, i32) {
    %c0_i32 = arith.constant 0 : i32
    %c0_i32_0 = arith.constant 0 : i32
    %c0_i32_1 = arith.constant 0 : i32
    return %arg0, %c0_i32, %c0_i32_0 : i32, i32, i32
  }
  func.func @transform_7(%arg0: i32, %arg1: i32) -> (i32, i32, i32) {
    %c0_i32 = arith.constant 0 : i32
    %c0_i32_0 = arith.constant 0 : i32
    %c0_i32_1 = arith.constant 0 : i32
    return %arg0, %c0_i32, %c0_i32_0 : i32, i32, i32
  }
  func.func @transform_8(%arg0: i32, %arg1: i32) -> (i32, i32) {
    %c0_i32 = arith.constant 0 : i32
    %c0_i32_0 = arith.constant 0 : i32
    %c0_i32_1 = arith.constant 0 : i32
    return %c0_i32, %c0_i32_0 : i32, i32
  }
}

</mosaic_0001>

<bundles_post_ra>
// kernel: tpu_custom_call.1
= control target key start
LH: loop header
LB: loop body
LE: loop exit
PB: predicated region body
PF: predicated region fallthrough
CT: control target
= control target key end

     0   :  { %s6248_s27 = smov 0   ;;  %s6250_s28 = smov 0   ;;  %s7607_s0 = inlined_call_operand.vmem [shape: f32[48,32], index: 0, kind: input, shape index: {}]   ;;  %s7608_s1 = inlined_call_operand.vmem [shape: f32[40,32], index: 1, kind: input, shape index: {}]   ;;  %s7609_s2 = inlined_call_operand.vmem [shape: f32[2,4,32,8], index: 2, kind: input, shape index: {}]   ;;  %s7610_s3 = inlined_call_operand.vmem [shape: f32[2,4,32,8], index: 3, kind: input, shape index: {}]   ;;  %s7611_s4 = inlined_call_operand.vmem [shape: f32[2,4,32,8], index: 4, kind: input, shape index: {}]   ;;  %s7612_s5 = inlined_call_operand.vmem [shape: f32[2,4,8,32], index: 5, kind: input, shape index: {}]   ;;  %s7613_s6 = inlined_call_operand.vmem [shape: f32[2,1,32], index: 6, kind: input, shape index: {}]   ;;  %s7614_s7 = inlined_call_operand.vmem [shape: f32[2,1,32], index: 7, kind: input, shape index: {}]   ;;  %s7615_s8 = inlined_call_operand.vmem [shape: f32[48,32], index: 8, kind: output, shape index: {}]  }
   0x1   :  { %s6252_s29 = smov 0   ;;  %s6254_s30 = smov 0  }
   0x2   :  { %s6256_s9 = smov 0  }
   0x3 LB: > { %7621 = sst [smem:[#allocation3_spill]] %s6190_s29  ;;  %s27_s10 = sadd.s32 1, %s6190_s29  ;;  %s6198_s9 = sphi %s6256_s9, %s18_s9   ;;  %s6194_s30 = sphi %s6254_s30, %s7632_s30   ;;  %s6190_s29 = sphi %s6252_s29, %s7631_s29   ;;  %s6186_s28 = sphi %s6250_s28, %s7630_s28   ;;  %s6182_s27 = sphi %s6248_s27, %s7629_s27  }
   0x4   : > { %7622 = sst [smem:[#allocation4_spill]] %s6194_s30  ;;  %s30_s11 = sadd.s32 1, %s6194_s30 }
   0x5   : > { %p28_p0 = scmp.ge.s32.totalorder %s27_s10, 4  ;;  %p5049_p1 = scmp.ge.s32.totalorder %s6198_s9, 1 }
   0x6   : > { %p338_p2 = scmp.lt.s32.totalorder %s6198_s9, 9 }
   0x7   : > { %s7634_s10 = smov (%p28_p0, %s27_s10), 0  ;;  %s7636_s11 = smov (!%p28_p0, %s30_s11), %s6194_s30 }
   0x8   : > { %7623 = sst [smem:[#allocation5_spill]] %s7634_s10  ;;  %p339_p3 = pnand %p5049_p1, %p338_p2 }
   0x9   : > { %p32_p4 = scmp.ge.s32.totalorder %s7636_s11, 2 }
   0xa   : > { %342 = sbr.rel (%p339_p3) target bundleno = 1757 (0x6dd), region = 52 }
   0xb   : > { %s7638_s11 = smov (%p32_p4, %s7636_s11), 0 }
   0xc   : > { %7624 = sst [smem:[#allocation6_spill]] %s7638_s11 }
   0xf   : > { %p403_p5 = scmp.lt.s32.totalorder %s6186_s28, 1  ;;  %p405_p6 = scmp.lt.s32.totalorder %s6182_s27, 3 }
  0x10   : > { %p444_p7 = scmp.eq.s32.totalorder %s6186_s28, 0  ;;  %p445_p8 = scmp.eq.s32.totalorder %s6182_s27, 0 }
  0x11   : > { %s6287_s12 = scalar_select %p403_p5, %s6186_s28, 1 }
  0x12   : > { %s406_s13 = scalar_select %p405_p6, %s6182_s27, 3 }
  0x13   : > { %s5051_s14 = sshll.u32 %s6287_s12, 4  ;;  %s5059_s15 = sshll.u32 %s6287_s12, 2 }
  0x14   : > { %s5050_s16 = sshll.u32 %s406_s13, 2  ;;  %s435_s17 = sadd.s32 %s5059_s15, %s406_s13 }
  0x15   : > { %s409_s18 = sadd.s32 %s5051_s14, %s5050_s16  ;;  %s5060_s19 = sshll.u32 %s435_s17, 3 }
  0x16   : > { %s5052_s20 = sshll.u32 %s409_s18, 3  ;;  %s6295_s23 = scalar_lea.vmem %s7612_s5, %s5060_s19 }
  0x17   : > { %s6300_s26 = scalar_lea.vmem %s7609_s2, %s5052_s20  ;;  %s6305_s30 = scalar_lea.vmem %s7610_s3, %s5052_s20 }
  0x18   : > { %s6310_s14 = scalar_lea.vmem %s7611_s4, %s5052_s20  ;;  %s440_s17 = scalar_lea.vmem %s7613_s6, %s6287_s12 }
  0x19   : > { %s443_s21 = scalar_lea.vmem %s7614_s7, %s6287_s12  ;;  %p446_p9 = pnand %p445_p8, %p444_p7 }
  0x1b   : > { %449 = sbr.rel (%p446_p9) target bundleno = 36 (0x24), region = 56 }
  0x20   : > { %v450_v0 = vld [vmem:[%s7607_s0] sm:$0xff]  ;;  %vm456_vm0 = vcmask 261120   ;;  %v451_v1 = vld [vmem:[%s7607_s0 + $0x8] sm:$0xff]  ;;  %v452_v2 = vld [vmem:[%s7607_s0 + $0x10] sm:$0xff] }
  0x21   : > { %457 = vst.msk [vmem:[%s7615_s8] sm:$0xff] %vm456_vm0, %v450_v0  ;;  %458 = vst.msk [vmem:[%s7615_s8 + $0x8] sm:$0xff] %vm456_vm0, %v451_v1  ;;  %v453_v3 = vld [vmem:[%s7607_s0 + $0x18] sm:$0xff]  ;;  %v454_v4 = vld [vmem:[%s7607_s0 + $0x20] sm:$0xff] }
  0x22   : > { %459 = vst.msk [vmem:[%s7615_s8 + $0x10] sm:$0xff] %vm456_vm0, %v452_v2  ;;  %v455_v5 = vld [vmem:[%s7607_s0 + $0x28] sm:$0xff]  ;;  %460 = vst.msk [vmem:[%s7615_s8 + $0x18] sm:$0xff] %vm456_vm0, %v453_v3 }
  0x23   : > { %461 = vst.msk [vmem:[%s7615_s8 + $0x20] sm:$0xff] %vm456_vm0, %v454_v4  ;;  %462 = vst.msk [vmem:[%s7615_s8 + $0x28] sm:$0xff] %vm456_vm0, %v455_v5 }
  0x24 PF: > { %p5061_p10 = scmp.ne.s32.totalorder %s6182_s27, 0 }
  0x26   : > { %465 = sbr.rel (%p5061_p10) target bundleno = 47 (0x2f), region = 60 }
  0x2b   : > { %vm466_vm1 = vcmask 261120   ;;  %v6200_v6 = vmov 0.0  }
  0x2c   : > { %467 = vst.msk [vmem:[#allocation2] sm:$0xff] %vm466_vm1, %v6200_v6  ;;  %468 = vst.msk [vmem:[#allocation2 + $0x8] sm:$0xff] %vm466_vm1, %v6200_v6 }
  0x2d   : > { %469 = vst.msk [vmem:[#allocation2 + $0x10] sm:$0xff] %vm466_vm1, %v6200_v6  ;;  %470 = vst.msk [vmem:[#allocation2 + $0x18] sm:$0xff] %vm466_vm1, %v6200_v6 }
  0x2e   : > { %471 = vst.msk [vmem:[#allocation2 + $0x20] sm:$0xff] %vm466_vm1, %v6200_v6  ;;  %472 = vst.msk [vmem:[#allocation2 + $0x28] sm:$0xff] %vm466_vm1, %v6200_v6 }
  0x2f PF: > { %v487_v7 = vld [vmem:[%s6300_s26 + $0x18] sm:$0xff]  ;;  %v486_v8 = vld [vmem:[%s6300_s26 + $0x10] sm:$0xff]  ;;  %v485_v9 = vld [vmem:[%s6300_s26 + $0x8] sm:$0xff]  ;;  %vm488_vm2 = vcmask 261120   ;;  %vm6202_vm3 = vmmov 0   ;;  %vm2544_vm4 = vcmask 64512  }
  0x30   : > { %v6364_v10 = vand.u32 4294901760, %v487_v7  ;;  %v6366_v11 = vand.u32 4294901760, %v486_v8  ;;  %v6368_v12 = vand.u32 4294901760, %v485_v9  ;;  %v484_v13 = vld [vmem:[%s6300_s26] sm:$0xff]  ;;  %v6379_v15 = vld [vmem:[%s7615_s8 + $0x8] sm:$0xff]  ;;  %v6390_v19 = vld [vmem:[%s7615_s8 + $0x10] sm:$0xff] }
  0x31   : > { %v6374_v14 = vld [vmem:[%s7615_s8] sm:$0xff]  ;;  %v6381_v16 = vand.u32 4294901760, %v484_v13  ;;  %v493_v18 = vsel %vm488_vm2, %v6379_v15, 0  ;;  %v6395_v20 = vld [vmem:[%s7615_s8 + $0x18] sm:$0xff]  ;;  %v496_v26 = vsel %vm488_vm2, %v6390_v19, 0  ;;  %v6466_v46 = vld [vmem:[%s7615_s8 + $0x28] sm:$0xff] }
  0x32   : > { %v490_v17 = vsel %vm488_vm2, %v6374_v14, 0  ;;  %5409 = vmatprep.subr.mxu0 %v6364_v10  ;;  %v662_v21 = vsub.f32 %v487_v7, %v6364_v10  ;;  %v6401_v23 = vand.u32 4294901760, %v493_v18  ;;  %v6404_v24 = vsub.f32 %v486_v8, %v6366_v11  ;;  %v6461_v45 = vld [vmem:[%s7615_s8 + $0x20] sm:$0xff]  ;;  %7625 = vst [vmem:[#allocation7_spill] sm:$0xff] %v6466_v46  ;;  %p5062_p11 = scmp.ne.s32.totalorder %s6182_s27, 3 }
  0x33   : > { %v6399_v22 = vand.u32 4294901760, %v490_v17  ;;  %5410 = vmatpush3.msra.mxu0 %v6364_v10  ;;  %v6408_v25 = vsub.f32 %v485_v9, %v6368_v12  ;;  %v499_v27 = vsel %vm488_vm2, %v6395_v20, 0  ;;  %v6415_v28 = vsub.f32 %v484_v13, %v6381_v16  ;;  %v1210_v9 = vld [vmem:[%s6305_s30 + $0x18] sm:$0xff]  ;;  %v479_v13 = vld [vmem:[%s7608_s1] sm:$0xff] }
  0x34   : > { %5411 = vmatprep.subr.mxu0 %v6366_v11  ;;  %v6418_v29 = vand.u32 4294901760, %v662_v21  ;;  %v6424_v31 = vsub.f32 %v493_v18, %v6401_v23  ;;  %v6427_v32 = vand.u32 4294901760, %v6404_v24  ;;  %v6434_v34 = vand.u32 4294901760, %v496_v26  ;;  %v1209_v18 = vld [vmem:[%s6305_s30 + $0x10] sm:$0xff] }
  0x35   : > { %v6421_v30 = vsub.f32 %v490_v17, %v6399_v22  ;;  %5434 = vmatprep.mubr.f32.mxu1 %v6399_v22  ;;  %5412 = vmatpush3.msra.mxu0 %v6366_v11  ;;  %v6432_v33 = vand.u32 4294901760, %v6408_v25  ;;  %v6436_v35 = vand.u32 4294901760, %v499_v27  ;;  %v6439_v36 = vand.u32 4294901760, %v6415_v28 }
  0x36   : > { %5413 = vmatprep.subr.mxu0 %v6368_v12  ;;  %v664_v37 = vsub.f32 %v662_v21, %v6418_v29  ;;  %v588_v39 = vand.u32 4294901760, %v6424_v31  ;;  %v671_v40 = vsub.f32 %v6404_v24, %v6427_v32  ;;  %v6451_v42 = vsub.f32 %v496_v26, %v6434_v34  ;;  %v1208_v26 = vld [vmem:[%s6305_s30 + $0x8] sm:$0xff] }
  0x37   : > { %v578_v38 = vand.u32 4294901760, %v6421_v30  ;;  %5414 = vmatpush3.msra.mxu0 %v6368_v12  ;;  %v678_v41 = vsub.f32 %v6408_v25, %v6432_v33  ;;  %v6454_v43 = vsub.f32 %v499_v27, %v6436_v35  ;;  %v685_v44 = vsub.f32 %v6415_v28, %v6439_v36  ;;  %v480_v27 = vld [vmem:[%s7608_s1 + $0x8] sm:$0xff] }
  0x38   : > { %5415 = vmatprep.subr.mxu0 %v6381_v16  ;;  %v665_v47 = vand.u32 4294901760, %v664_v37  ;;  %v589_v49 = vsub.f32 %v6424_v31, %v588_v39  ;;  %v672_v50 = vand.u32 4294901760, %v671_v40  ;;  %v598_v52 = vand.u32 4294901760, %v6451_v42  ;;  %v481_v37 = vld [vmem:[%s7608_s1 + $0x10] sm:$0xff] }
  0x39   : > { %v579_v48 = vsub.f32 %v6421_v30, %v578_v38  ;;  %5416 = vmatpush3.msra.mxu0 %v6381_v16  ;;  %v679_v51 = vand.u32 4294901760, %v678_v41  ;;  %v608_v53 = vand.u32 4294901760, %v6454_v43  ;;  %v502_v56 = vsel %vm488_vm2, %v6461_v45, 0 }
  0x3a   : > { %5426 = vmatprep.subr.mxu1 %v665_v47  ;;  %v590_v55 = vand.u32 4294901760, %v589_v49  ;;  %5443 = vmatprep.subr.mxu0 %v662_v21  ;;  %v505_v57 = vsel %vm488_vm2, %v6466_v46, 0  ;;  %v599_v58 = vsub.f32 %v6451_v42, %v598_v52  ;;  %v6488_v60 = vand.u32 4294901760, %v502_v56 }
  0x3b   : > { %v580_v54 = vand.u32 4294901760, %v579_v48  ;;  %5427 = vmatpush3.msra.mxu1 %v665_v47  ;;  %v609_v59 = vsub.f32 %v6454_v43, %v608_v53  ;;  %v6490_v61 = vand.u32 4294901760, %v505_v57  ;;  %v686_v62 = vand.u32 4294901760, %v685_v44 }
  0x3c   : > { %5428 = vmatprep.subr.mxu1 %v672_v50  ;;  %v600_v63 = vand.u32 4294901760, %v599_v58  ;;  %v6493_v1 = vsub.f32 %v502_v56, %v6488_v60  ;;  %v6531_v17 = vand.u32 4294901760, %v1210_v9  ;;  %v1218_v41 = vsel %vm488_vm2, %v481_v37, 0 }
  0x3d   : > { %5417 = vmatprep.mubr.f32.mxu0 %v580_v54  ;;  %5429 = vmatpush3.msra.mxu1 %v672_v50  ;;  %v610_v0 = vand.u32 4294901760, %v609_v59  ;;  %v6496_v2 = vsub.f32 %v505_v57, %v6490_v61  ;;  %v6618_v48 = vand.u32 4294901760, %v1218_v41  ;;  %vm3297_vm5 = vcmask 326656  }
  0x3e   : > { %5418 = vmatmul.mubr.f32.vlgmr.msra.gmra.mxu0 %v590_v55  ;;  %5430 = vmatprep.subr.mxu1 %v679_v51  ;;  %v618_v3 = vand.u32 4294901760, %v6493_v1 }
  0x3f   : > { %5444 = vmatpush3.msra.mxu0 %v662_v21  ;;  %5420 = vmatprep.mubr.f32.mxu0 %v600_v63  ;;  %v628_v4 = vand.u32 4294901760, %v6496_v2  ;;  %v1212_v21 = vsel %vm488_vm2, %v479_v13, 0  ;;  %v6643_v55 = vsub.f32 %v1218_v41, %v6618_v48 }
  0x40   : > { %5431 = vmatpush3.msra.mxu1 %v679_v51  ;;  %5445 = vmatprep.subr.mxu0 %v6404_v24  ;;  %v619_v5 = vsub.f32 %v6493_v1, %v618_v3 }
  0x41   : > { %5432 = vmatprep.subr.mxu1 %v686_v62  ;;  %v629_v6 = vsub.f32 %v6496_v2, %v628_v4  ;;  %5446 = vmatpush3.msra.mxu0 %v6404_v24  ;;  %v6546_v24 = vsub.f32 %v1210_v9, %v6531_v17 }
  0x42   : > { %5421 = vmatmul.mubr.f32.gmra.mxu0 %v610_v0  ;;  %5433 = vmatpush3.msra.mxu1 %v686_v62  ;;  %v620_v7 = vand.u32 4294901760, %v619_v5  ;;  %v6666_v0 = vand.u32 4294901760, %v6643_v55 }
  0x43   : > { %5435 = vmatmul.mubr.f32.vlgmr.msra.gmra.mxu1 %v6401_v23  ;;  %5460 = vmatprep.subr.mxu1 %v6364_v10  ;;  %v630_v8 = vand.u32 4294901760, %v629_v6 }
  0x44   : > { %5461 = vmatpush3.msra.mxu1 %v6364_v10  ;;  %5447 = vmatprep.subr.mxu0 %v6408_v25 }
  0x45   : > { %5437 = vmatprep.mubr.f32.mxu1 %v6434_v34  ;;  %5423 = vmatprep.mubr.f32.mxu0 %v620_v7 }
  0x46   : > { %5448 = vmatpush3.msra.mxu0 %v6408_v25  ;;  %5462 = vmatprep.subr.mxu1 %v6366_v11  ;;  %v6548_v25 = vand.u32 4294901760, %v1209_v18 }
  0x47   : > { %5424 = vmatmul.mubr.f32.gmra.mxu0 %v630_v8  ;;  %5438 = vmatmul.mubr.f32.gmra.mxu1 %v6436_v35 }
  0x48   : > { %5449 = vmatprep.subr.mxu0 %v6415_v28  ;;  %5463 = vmatpush3.msra.mxu1 %v6366_v11 }
  0x49   : > { %5450 = vmatpush3.msra.mxu0 %v6415_v28  ;;  %5451 = vmatprep.mubr.f32.mxu0 %v6421_v30  ;;  %v6556_v28 = vand.u32 4294901760, %v1212_v21  ;;  %v6564_v30 = vand.u32 4294901760, %v1208_v26 }
  0x4a   : > { %5464 = vmatprep.subr.mxu1 %v6368_v12  ;;  %5440 = vmatprep.mubr.f32.mxu1 %v6488_v60 }
  0x4b   : > { %5452 = vmatmul.mubr.f32.vlgmr.msra.gmra.mxu0 %v6424_v31  ;;  %5465 = vmatpush3.msra.mxu1 %v6368_v12  ;;  %v1215_v31 = vsel %vm488_vm2, %v480_v27, 0  ;;  %v6591_v40 = vsub.f32 %v1208_v26, %v6564_v30  ;;  %v1884_v26 = vld [vmem:[%s6310_s14 + $0x8] sm:$0xff] }
  0x4c   : > { %5454 = vmatprep.mubr.f32.mxu0 %v6451_v42  ;;  %5441 = vmatmul.mubr.f32.gmra.mxu1 %v6490_v61  ;;  %v482_v42 = vld [vmem:[%s7608_s1 + $0x18] sm:$0xff] }
  0x4d   : > { %5466 = vmatprep.subr.mxu1 %v6381_v16  ;;  %5477 = vmatprep.subr.mxu0 %v6418_v29  ;;  %v1386_v49 = vand.u32 4294901760, %v6591_v40  ;;  %v1221_v50 = vsel %vm488_vm2, %v482_v42, 0 }
  0x4e   : > { %5467 = vmatpush3.msra.mxu1 %v6381_v16  ;;  %5468 = vmatprep.mubr.f32.mxu1 %v578_v38  ;;  %v6645_v56 = vand.u32 4294901760, %v1221_v50 }
  0x4f   : > { %5455 = vmatmul.mubr.f32.gmra.mxu0 %v6454_v43  ;;  %5494 = vmatprep.subr.mxu1 %v6364_v10  ;;  %v1387_v57 = vsub.f32 %v6591_v40, %v1386_v49 }
  0x50   : > { %5478 = vmatpush3.msra.mxu0 %v6418_v29  ;;  %5469 = vmatmul.mubr.f32.vlgmr.msra.gmra.mxu1 %v588_v39  ;;  %v1207_v29 = vld [vmem:[%s6305_s30] sm:$0xff]  ;;  %v6586_v39 = vand.u32 4294901760, %v1215_v31 }
  0x51   : > { %5479 = vmatprep.subr.mxu0 %v6427_v32  ;;  %5457 = vmatprep.mubr.f32.mxu0 %v6493_v1  ;;  %v6579_v38 = vand.u32 4294901760, %v1207_v29  ;;  %v6669_v1 = vsub.f32 %v1221_v50, %v6645_v56 }
  0x52   : > { %5480 = vmatpush3.msra.mxu0 %v6427_v32  ;;  %5495 = vmatpush3.msra.mxu1 %v6364_v10  ;;  %v6570_v32 = vsub.f32 %v1209_v18, %v6548_v25  ;;  %v1372_v10 = vand.u32 4294901760, %v6546_v24  ;;  %v6616_v47 = vsub.f32 %v1215_v31, %v6586_v39  ;;  %v1886_v18 = vld [vmem:[%s6310_s14 + $0x18] sm:$0xff]  ;;  %v6793_v31 = vand.u32 4294901760, %v1884_v26 }
  0x53   : > { %5458 = vmatmul.mubr.f32.gmra.mxu0 %v6496_v2  ;;  %5481 = vmatprep.subr.mxu0 %v6432_v33  ;;  %v6607_v43 = vsub.f32 %v1207_v29, %v6579_v38  ;;  %v1388_v2 = vand.u32 4294901760, %v1387_v57  ;;  %v6686_v5 = vand.u32 4294901760, %v6669_v1 }
  0x54   : > { %5471 = vmatprep.mubr.f32.mxu1 %v598_v52  ;;  %5482 = vmatpush3.msra.mxu0 %v6432_v33  ;;  %v6582_v33 = vsub.f32 %v1212_v21, %v6556_v28  ;;  %v1885_v21 = vld [vmem:[%s6310_s14 + $0x10] sm:$0xff] }
  0x55   : > { %5496 = vmatprep.subr.mxu1 %v6366_v11  ;;  %5472 = vmatmul.mubr.f32.gmra.mxu1 %v608_v53  ;;  %v1393_v54 = vand.u32 4294901760, %v6607_v43  ;;  %v1328_v7 = vsub.f32 %v6669_v1, %v6686_v5  ;;  %v6781_v27 = vand.u32 4294901760, %v1885_v21 }
  0x56   : > { %5483 = vmatprep.subr.mxu0 %v6439_v36  ;;  %5497 = vmatpush3.msra.mxu1 %v6366_v11  ;;  %v1373_v11 = vsub.f32 %v6546_v24, %v1372_v10  ;;  %v6610_v44 = vand.u32 4294901760, %v6582_v33 }
  0x57   : > { %5484 = vmatpush3.msra.mxu0 %v6439_v36  ;;  %5485 = vmatprep.mubr.f32.mxu0 %v6399_v22  ;;  %v1379_v36 = vand.u32 4294901760, %v6570_v32  ;;  %v1394_v62 = vsub.f32 %v6607_v43, %v1393_v54 }
  0x58   : > { %5498 = vmatprep.subr.mxu1 %v6368_v12  ;;  %5486 = vmatmul.mubr.f32.vlgmr.msra.gmra.mxu0 %v6401_v23  ;;  %v1374_v51 = vand.u32 4294901760, %v1373_v11  ;;  %v1298_v53 = vsub.f32 %v6582_v33, %v6610_v44 }
  0x59   : > { %5474 = vmatprep.mubr.f32.mxu1 %v618_v3  ;;  %5499 = vmatpush3.msra.mxu1 %v6368_v12  ;;  %v6201_v12 = vmov 0.0   ;;  %v1380_v52 = vsub.f32 %v6570_v32, %v1379_v36  ;;  %v1395_v3 = vand.u32 4294901760, %v1394_v62 }
  0x5a   : > { %5488 = vmatprep.mubr.f32.mxu0 %v6434_v34  ;;  %5475 = vmatmul.mubr.f32.gmra.mxu1 %v628_v4  ;;  %v6656_v59 = vand.u32 4294901760, %v1298_v53 }
  0x5b   : > { %5500 = vmatprep.subr.mxu1 %v6381_v16  ;;  %5511 = vmatprep.subr.mxu0 %v6201_v12  ;;  %v1381_v58 = vand.u32 4294901760, %v1380_v52 }
  0x5c   : > { %5501 = vmatpush3.msra.mxu1 %v6381_v16  ;;  %5489 = vmatmul.mubr.f32.gmra.mxu0 %v6436_v35  ;;  %v483_v16 = vld [vmem:[%s7608_s1 + $0x20] sm:$0xff] }
  0x5d   : > { %5502 = vmatprep.mubr.f32.mxu1 %v6399_v22  ;;  %5512 = vmatpush3.msra.mxu0 %v6531_v17  ;;  %v6640_v22 = vand.u32 4294901760, %v6616_v47 }
  0x5e   : > { %5534 = vmatprep.subr.mxu1 %v6201_v12  ;;  %5503 = vmatmul.mubr.f32.vlgmr.msra.gmra.mxu1 %v6401_v23  ;;  %v1224_v23 = vsel %vm488_vm2, %v483_v16, 0 }
  0x5f   : > { %5513 = vmatprep.subr.mxu0 %v6201_v12  ;;  %5491 = vmatprep.mubr.f32.mxu0 %v6488_v60  ;;  %v1308_v63 = vsub.f32 %v6616_v47, %v6640_v22 }
  0x60   : > { %5514 = vmatpush3.msra.mxu0 %v6548_v25  ;;  %5535 = vmatpush3.msra.mxu1 %v1374_v51 }
  0x61   : > { %5492 = vmatmul.mubr.f32.gmra.mxu0 %v6490_v61  ;;  %5515 = vmatprep.subr.mxu0 %v6201_v12  ;;  %v6681_v4 = vand.u32 4294901760, %v1308_v63 }
  0x62   : > { %5505 = vmatprep.mubr.f32.mxu1 %v6434_v34  ;;  %5516 = vmatpush3.msra.mxu0 %v6564_v30  ;;  %v6671_v34 = vand.u32 4294901760, %v1224_v23 }
  0x63   : > { %5536 = vmatprep.subr.mxu1 %v6201_v12  ;;  %5506 = vmatmul.mubr.f32.gmra.mxu1 %v6436_v35  ;;  %v1318_v35 = vsub.f32 %v6643_v55, %v6666_v0 }
  0x64   : > { %5517 = vmatprep.subr.mxu0 %v6201_v12  ;;  %5537 = vmatpush3.msra.mxu1 %v1381_v58  ;;  %v6689_v6 = vsub.f32 %v1224_v23, %v6671_v34 }
  0x65   : > { %5518 = vmatpush3.msra.mxu0 %v6579_v38  ;;  %5519 = vmatprep.mubr.msk.f32.mxu0 %vm6202_vm3, %v6201_v12 }
  0x66   : > { %5538 = vmatprep.subr.mxu1 %v6201_v12  ;;  %5520 = vmatmul.mubr.f32.vlgmr.msra.gmra.mxu0 %v6656_v59  ;;  %v6704_v8 = vand.u32 4294901760, %v6689_v6 }
  0x67   : > { %5508 = vmatprep.mubr.f32.mxu1 %v6488_v60  ;;  %5539 = vmatpush3.msra.mxu1 %v1388_v2  ;;  %v6699_v60 = vand.u32 4294901760, %v1318_v35 }
  0x68   : > { %5522 = vmatprep.mubr.msk.f32.mxu0 %vm6202_vm3, %v6201_v12  ;;  %5509 = vmatmul.mubr.f32.gmra.mxu1 %v6490_v61  ;;  %v6716_v61 = vand.u32 4294901760, %v1328_v7  ;;  %v1338_v9 = vsub.f32 %v6689_v6, %v6704_v8 }
  0x69   : > { %5540 = vmatprep.subr.mxu1 %v6201_v12  ;;  %5557 = vmatprep.subr.mxu0 %v6201_v12 }
  0x6a   : > { %5541 = vmatpush3.msra.mxu1 %v1395_v3  ;;  %5523 = vmatmul.mubr.f32.gmra.mxu0 %v6681_v4  ;;  %v6730_v13 = vand.u32 4294901760, %v1338_v9 }
  0x6b   : > { %5542 = vmatprep.mubr.msk.f32.mxu1 %vm6202_vm3, %v6201_v12  ;;  %5558 = vmatpush3.msra.mxu0 %v6546_v24  ;;  %v6773_v24 = vand.u32 4294901760, %v1886_v18 }
  0x6c   : > { %5580 = vmatprep.subr.mxu1 %v6201_v12  ;;  %5543 = vmatmul.mubr.f32.vlgmr.msra.gmra.mxu1 %v6556_v28 }
  0x6d   : > { %5525 = vmatprep.mubr.msk.f32.mxu0 %vm6202_vm3, %v6201_v12  ;;  %5581 = vmatpush3.msra.mxu1 %v6531_v17  ;;  %v6791_v29 = vsub.f32 %v1886_v18, %v6773_v24 }
  0x6e   : > { %5545 = vmatprep.mubr.msk.f32.mxu1 %vm6202_vm3, %v6201_v12  ;;  %5526 = vmatmul.mubr.f32.gmra.mxu0 %v6699_v60 }
  0x6f   : > { %5559 = vmatprep.subr.mxu0 %v6201_v12  ;;  %5528 = vmatprep.mubr.msk.f32.mxu0 %vm6202_vm3, %v6201_v12 }
  0x70   : > { %5560 = vmatpush3.msra.mxu0 %v6570_v32  ;;  %5546 = vmatmul.mubr.f32.gmra.mxu1 %v6586_v39 }
  0x71   : > { %5582 = vmatprep.subr.mxu1 %v6201_v12  ;;  %5548 = vmatprep.mubr.msk.f32.mxu1 %vm6202_vm3, %v6201_v12 }
  0x72   : > { %5583 = vmatpush3.msra.mxu1 %v6548_v25  ;;  %5529 = vmatmul.mubr.f32.gmra.mxu0 %v6716_v61 }
  0x73   : > { %5561 = vmatprep.subr.mxu0 %v6201_v12  ;;  %5531 = vmatprep.mubr.msk.f32.mxu0 %vm6202_vm3, %v6201_v12 }
  0x74   : > { %5562 = vmatpush3.msra.mxu0 %v6591_v40  ;;  %5549 = vmatmul.mubr.f32.gmra.mxu1 %v6618_v48 }
  0x75   : > { %5584 = vmatprep.subr.mxu1 %v6201_v12  ;;  %5551 = vmatprep.mubr.msk.f32.mxu1 %vm6202_vm3, %v6201_v12 }
  0x76   : > { %5585 = vmatpush3.msra.mxu1 %v6564_v30  ;;  %5532 = vmatmul.mubr.f32.gmra.mxu0 %v6730_v13 }
  0x77   : > { %5563 = vmatprep.subr.mxu0 %v6201_v12  ;;  %5565 = vmatprep.mubr.msk.f32.mxu0 %vm6202_vm3, %v6201_v12 }
  0x78   : > { %5564 = vmatpush3.msra.mxu0 %v6607_v43  ;;  %5552 = vmatmul.mubr.f32.gmra.mxu1 %v6645_v56 }
  0x79   : > { %5586 = vmatprep.subr.mxu1 %v6201_v12  ;;  %5554 = vmatprep.mubr.msk.f32.mxu1 %vm6202_vm3, %v6201_v12 }
  0x7a   : > { %5587 = vmatpush3.msra.mxu1 %v6579_v38  ;;  %5566 = vmatmul.mubr.f32.vlgmr.msra.gmra.mxu0 %v6582_v33 }
  0x7b   : > { %5603 = vmatprep.subr.mxu0 %v6201_v12  ;;  %5568 = vmatprep.mubr.msk.f32.mxu0 %vm6202_vm3, %v6201_v12 }
  0x7c   : > { %5604 = vmatpush3.msra.mxu0 %v1372_v10  ;;  %5555 = vmatmul.mubr.f32.gmra.mxu1 %v6671_v34  ;;  %v6813_v10 = vsub.f32 %v1884_v26, %v6793_v31 }
  0x7d   : > { %5626 = vmatprep.subr.mxu1 %v6201_v12  ;;  %5588 = vmatprep.mubr.msk.f32.mxu1 %vm6202_vm3, %v6201_v12 }
  0x7e   : > { %5605 = vmatprep.subr.mxu0 %v6201_v12  ;;  %5569 = vmatmul.mubr.f32.gmra.mxu0 %v6616_v47  ;;  %v2047_v41 = vand.u32 4294901760, %v6813_v10 }
  0x7f   : > { %5571 = vmatprep.mubr.msk.f32.mxu0 %vm6202_vm3, %v6201_v12  ;;  %5606 = vmatpush3.msra.mxu0 %v1379_v36 }
  0x80   : > { %5589 = vmatmul.mubr.f32.vlgmr.msra.gmra.mxu1 %v6610_v44  ;;  %5607 = vmatprep.subr.mxu0 %v6201_v12  ;;  %v2048_v43 = vsub.f32 %v6813_v10, %v2047_v41 }
  0x81   : > { %5627 = vmatpush3.msra.mxu1 %v6531_v17  ;;  %5591 = vmatprep.mubr.msk.f32.mxu1 %vm6202_vm3, %v6201_v12  ;;  %v1883_v17 = vld [vmem:[%s6310_s14] sm:$0xff] }
  0x82   : > { %5572 = vmatmul.mubr.f32.gmra.mxu0 %v6643_v55  ;;  %5628 = vmatprep.subr.mxu1 %v6201_v12  ;;  %v6803_v32 = vand.u32 4294901760, %v1883_v17  ;;  %v2049_v51 = vand.u32 4294901760, %v2048_v43 }
  0x83   : > { %5574 = vmatprep.mubr.msk.f32.mxu0 %vm6202_vm3, %v6201_v12  ;;  %5629 = vmatpush3.msra.mxu1 %v6548_v25  ;;  %v6801_v25 = vsub.f32 %v1885_v21, %v6781_v27 }
  0x84   : > { %5592 = vmatmul.mubr.f32.gmra.mxu1 %v6640_v22  ;;  %5608 = vmatpush3.msra.mxu0 %v1386_v49  ;;  %v6822_v40 = vsub.f32 %v1883_v17, %v6803_v32 }
  0x85   : > { %5594 = vmatprep.mubr.msk.f32.mxu1 %vm6202_vm3, %v6201_v12  ;;  %5630 = vmatprep.subr.mxu1 %v6201_v12  ;;  %v2040_v37 = vand.u32 4294901760, %v6801_v25 }
  0x86   : > { %5575 = vmatmul.mubr.f32.gmra.mxu0 %v6669_v1  ;;  %5631 = vmatpush3.msra.mxu1 %v6564_v30  ;;  %v2033_v30 = vand.u32 4294901760, %v6791_v29  ;;  %v2054_v36 = vand.u32 4294901760, %v6822_v40 }
  0x87   : > { %5577 = vmatprep.mubr.msk.f32.mxu0 %vm6202_vm3, %v6201_v12  ;;  %5609 = vmatprep.subr.mxu0 %v6201_v12  ;;  %v2041_v11 = vsub.f32 %v6801_v25, %v2040_v37 }
  0x88   : > { %5595 = vmatmul.mubr.f32.gmra.mxu1 %v6666_v0  ;;  %5610 = vmatpush3.msra.mxu0 %v1393_v54  ;;  %v2055_v50 = vsub.f32 %v6822_v40, %v2054_v36 }
  0x89   : > { %5597 = vmatprep.mubr.msk.f32.mxu1 %vm6202_vm3, %v6201_v12  ;;  %5632 = vmatprep.subr.mxu1 %v6201_v12  ;;  %v2042_v49 = vand.u32 4294901760, %v2041_v11 }
  0x8a   : > { %5578 = vmatmul.mubr.f32.gmra.mxu0 %v6689_v6  ;;  %5633 = vmatpush3.msra.mxu1 %v6579_v38  ;;  %v2034_v38 = vsub.f32 %v6791_v29, %v2033_v30  ;;  %v2056_v52 = vand.u32 4294901760, %v2055_v50 }
  0x8b   : > { %5611 = vmatprep.mubr.msk.f32.mxu0 %vm6202_vm3, %v6201_v12  ;;  %5672 = vmatprep.subr.mxu1 %v6201_v12 }
  0x8c   : > { %5598 = vmatmul.mubr.f32.gmra.mxu1 %v6686_v5  ;;  %5649 = vmatprep.subr.mxu0 %v6201_v12  ;;  %v2035_v42 = vand.u32 4294901760, %v2034_v38 }
  0x8d   : > { %5600 = vmatprep.mubr.msk.f32.mxu1 %vm6202_vm3, %v6201_v12 }
  0x8e   : > { %5612 = vmatmul.mubr.f32.vlgmr.msra.gmra.mxu0 %v6556_v28 }
  0x8f   : > { %5614 = vmatprep.mubr.msk.f32.mxu0 %vm6202_vm3, %v6201_v12  ;;  %5650 = vmatpush3.msra.mxu0 %v6773_v24 }
  0x90   : > { %5601 = vmatmul.mubr.f32.gmra.mxu1 %v6704_v8  ;;  %5651 = vmatprep.subr.mxu0 %v6201_v12 }
  0x91   : > { %5634 = vmatprep.mubr.msk.f32.mxu1 %vm6202_vm3, %v6201_v12  ;;  %5652 = vmatpush3.msra.mxu0 %v6781_v27 }
  0x92   : > { %5615 = vmatmul.mubr.f32.gmra.mxu0 %v6586_v39  ;;  %5653 = vmatprep.subr.mxu0 %v6201_v12 }
  0x93   : > { %5617 = vmatprep.mubr.msk.f32.mxu0 %vm6202_vm3, %v6201_v12  ;;  %5654 = vmatpush3.msra.mxu0 %v6793_v31 }
  0x94   : > { %5635 = vmatmul.mubr.f32.vlgmr.msra.gmra.mxu1 %v6556_v28  ;;  %5655 = vmatprep.subr.mxu0 %v6201_v12 }
  0x95   : > { %5637 = vmatprep.mubr.msk.f32.mxu1 %vm6202_vm3, %v6201_v12  ;;  %5673 = vmatpush3.msra.mxu1 %v2035_v42 }
  0x96   : > { %5618 = vmatmul.mubr.f32.gmra.mxu0 %v6618_v48  ;;  %5674 = vmatprep.subr.mxu1 %v6201_v12 }
  0x97   : > { %5620 = vmatprep.mubr.msk.f32.mxu0 %vm6202_vm3, %v6201_v12  ;;  %5675 = vmatpush3.msra.mxu1 %v2042_v49 }
  0x98   : > { %5638 = vmatmul.mubr.f32.gmra.mxu1 %v6586_v39  ;;  %5676 = vmatprep.subr.mxu1 %v6201_v12 }
  0x99   : > { %5640 = vmatprep.mubr.msk.f32.mxu1 %vm6202_vm3, %v6201_v12  ;;  %5677 = vmatpush3.msra.mxu1 %v2049_v51 }
  0x9a   : > { %5621 = vmatmul.mubr.f32.gmra.mxu0 %v6645_v56  ;;  %5678 = vmatprep.subr.mxu1 %v6201_v12 }
  0x9b   : > { %5623 = vmatprep.mubr.msk.f32.mxu0 %vm6202_vm3, %v6201_v12  ;;  %5679 = vmatpush3.msra.mxu1 %v2056_v52 }
  0x9c   : > { %5641 = vmatmul.mubr.f32.gmra.mxu1 %v6618_v48  ;;  %5656 = vmatpush3.msra.mxu0 %v6803_v32 }
  0x9d   : > { %5643 = vmatprep.mubr.msk.f32.mxu1 %vm6202_vm3, %v6201_v12  ;;  %5718 = vmatprep.subr.mxu1 %v6201_v12 }
  0x9e   : > { %5624 = vmatmul.mubr.f32.gmra.mxu0 %v6671_v34  ;;  %5695 = vmatprep.subr.mxu0 %v6201_v12 }
  0x9f   : > { %5657 = vmatprep.mubr.msk.f32.mxu0 %vm6202_vm3, %v6201_v12 }
  0xa0   : > { %5644 = vmatmul.mubr.f32.gmra.mxu1 %v6645_v56 }
  0xa1   : > { %5646 = vmatprep.mubr.msk.f32.mxu1 %vm6202_vm3, %v6201_v12 }
  0xa2   : > { %5658 = vmatmul.mubr.f32.vlgmr.msra.gmra.mxu0 %v6656_v59 }
  0xa3   : > { %5660 = vmatprep.mubr.msk.f32.mxu0 %vm6202_vm3, %v6201_v12  ;;  %5696 = vmatpush3.msra.mxu0 %v6791_v29 }
  0xa4   : > { %5647 = vmatmul.mubr.f32.gmra.mxu1 %v6671_v34  ;;  %5697 = vmatprep.subr.mxu0 %v6201_v12 }
  0xa5   : > { %5680 = vmatprep.mubr.msk.f32.mxu1 %vm6202_vm3, %v6201_v12  ;;  %5698 = vmatpush3.msra.mxu0 %v6801_v25 }
  0xa6   : > { %5661 = vmatmul.mubr.f32.gmra.mxu0 %v6681_v4  ;;  %5699 = vmatprep.subr.mxu0 %v6201_v12 }
  0xa7   : > { %5663 = vmatprep.mubr.msk.f32.mxu0 %vm6202_vm3, %v6201_v12  ;;  %5700 = vmatpush3.msra.mxu0 %v6813_v10 }
  0xa8   : > { %5681 = vmatmul.mubr.f32.vlgmr.msra.gmra.mxu1 %v6556_v28  ;;  %5701 = vmatprep.subr.mxu0 %v6201_v12 }
  0xa9   : > { %5683 = vmatprep.mubr.msk.f32.mxu1 %vm6202_vm3, %v6201_v12  ;;  %5719 = vmatpush3.msra.mxu1 %v6773_v24 }
  0xaa   : > { %5720 = vmatprep.subr.mxu1 %v6201_v12  ;;  %5664 = vmatmul.mubr.f32.gmra.mxu0 %v6699_v60 }
  0xab   : > { %5721 = vmatpush3.msra.mxu1 %v6781_v27  ;;  %5666 = vmatprep.mubr.msk.f32.mxu0 %vm6202_vm3, %v6201_v12 }
  0xac   : > { %5684 = vmatmul.mubr.f32.gmra.mxu1 %v6586_v39  ;;  %5722 = vmatprep.subr.mxu1 %v6201_v12 }
  0xad   : > { %5686 = vmatprep.mubr.msk.f32.mxu1 %vm6202_vm3, %v6201_v12  ;;  %5723 = vmatpush3.msra.mxu1 %v6793_v31 }
  0xae   : > { %5724 = vmatprep.subr.mxu1 %v6201_v12  ;;  %5667 = vmatmul.mubr.f32.gmra.mxu0 %v6716_v61 }
  0xaf   : > { %5725 = vmatpush3.msra.mxu1 %v6803_v32  ;;  %5669 = vmatprep.mubr.msk.f32.mxu0 %vm6202_vm3, %v6201_v12 }
  0xb0   : > { %5687 = vmatmul.mubr.f32.gmra.mxu1 %v6618_v48  ;;  %5702 = vmatpush3.msra.mxu0 %v6822_v40 }
  0xb1   : > { %5689 = vmatprep.mubr.msk.f32.mxu1 %vm6202_vm3, %v6201_v12  ;;  %5764 = vmatprep.subr.mxu1 %v6201_v12 }
  0xb2   : > { %5670 = vmatmul.mubr.f32.gmra.mxu0 %v6730_v13  ;;  %5741 = vmatprep.subr.mxu0 %v6201_v12 }
  0xb3   : > { %5703 = vmatprep.mubr.msk.f32.mxu0 %vm6202_vm3, %v6201_v12 }
  0xb4   : > { %5690 = vmatmul.mubr.f32.gmra.mxu1 %v6645_v56 }
  0xb5   : > { %5692 = vmatprep.mubr.msk.f32.mxu1 %vm6202_vm3, %v6201_v12 }
  0xb6   : > { %5704 = vmatmul.mubr.f32.vlgmr.msra.gmra.mxu0 %v6582_v33 }
  0xb7   : > { %5706 = vmatprep.mubr.msk.f32.mxu0 %vm6202_vm3, %v6201_v12  ;;  %5742 = vmatpush3.msra.mxu0 %v2033_v30 }
  0xb8   : > { %5693 = vmatmul.mubr.f32.gmra.mxu1 %v6671_v34  ;;  %5743 = vmatprep.subr.mxu0 %v6201_v12 }
  0xb9   : > { %5726 = vmatprep.mubr.msk.f32.mxu1 %vm6202_vm3, %v6201_v12  ;;  %5744 = vmatpush3.msra.mxu0 %v2040_v37 }
  0xba   : > { %5707 = vmatmul.mubr.f32.gmra.mxu0 %v6616_v47  ;;  %5745 = vmatprep.subr.mxu0 %v6201_v12 }
  0xbb   : > { %5709 = vmatprep.mubr.msk.f32.mxu0 %vm6202_vm3, %v6201_v12  ;;  %5746 = vmatpush3.msra.mxu0 %v2047_v41 }
  0xbc   : > { %5727 = vmatmul.mubr.f32.vlgmr.msra.gmra.mxu1 %v6610_v44  ;;  %5747 = vmatprep.subr.mxu0 %v6201_v12 }
  0xbd   : > { %5729 = vmatprep.mubr.msk.f32.mxu1 %vm6202_vm3, %v6201_v12  ;;  %5765 = vmatpush3.msra.mxu1 %v6773_v24 }
  0xbe   : > { %5766 = vmatprep.subr.mxu1 %v6201_v12  ;;  %5710 = vmatmul.mubr.f32.gmra.mxu0 %v6643_v55 }
  0xbf   : > { %5767 = vmatpush3.msra.mxu1 %v6781_v27  ;;  %5712 = vmatprep.mubr.msk.f32.mxu0 %vm6202_vm3, %v6201_v12 }
  0xc0   : > { %5730 = vmatmul.mubr.f32.gmra.mxu1 %v6640_v22  ;;  %5768 = vmatprep.subr.mxu1 %v6201_v12 }
  0xc1   : > { %5732 = vmatprep.mubr.msk.f32.mxu1 %vm6202_vm3, %v6201_v12  ;;  %5769 = vmatpush3.msra.mxu1 %v6793_v31 }
  0xc2   : > { %5770 = vmatprep.subr.mxu1 %v6201_v12  ;;  %5713 = vmatmul.mubr.f32.gmra.mxu0 %v6669_v1 }
  0xc3   : > { %5771 = vmatpush3.msra.mxu1 %v6803_v32  ;;  %5715 = vmatprep.mubr.msk.f32.mxu0 %vm6202_vm3, %v6201_v12 }
  0xc4   : > { %5733 = vmatmul.mubr.f32.gmra.mxu1 %v6666_v0  ;;  %5748 = vmatpush3.msra.mxu0 %v2054_v36 }
  0xc5   : > { %5735 = vmatprep.mubr.msk.f32.mxu1 %vm6202_vm3, %v6201_v12 }
  0xc6   : > { %5716 = vmatmul.mubr.f32.gmra.mxu0 %v6689_v6 }
  0xc7   : > { %5749 = vmatprep.mubr.msk.f32.mxu0 %vm6202_vm3, %v6201_v12 }
  0xc8   : > { %5736 = vmatmul.mubr.f32.gmra.mxu1 %v6686_v5 }
  0xc9   : > { %5738 = vmatprep.mubr.msk.f32.mxu1 %vm6202_vm3, %v6201_v12 }
  0xca   : > { %5750 = vmatmul.mubr.f32.vlgmr.msra.gmra.mxu0 %v6556_v28 }
  0xcb   : > { %5752 = vmatprep.mubr.msk.f32.mxu0 %vm6202_vm3, %v6201_v12 }
  0xcc   : > { %5739 = vmatmul.mubr.f32.gmra.mxu1 %v6704_v8 }
  0xcd   : > { %5772 = vmatprep.mubr.msk.f32.mxu1 %vm6202_vm3, %v6201_v12 }
  0xce   : > { %5753 = vmatmul.mubr.f32.gmra.mxu0 %v6586_v39 }
  0xcf   : > { %5755 = vmatprep.mubr.msk.f32.mxu0 %vm6202_vm3, %v6201_v12 }
  0xd0   : > { %5773 = vmatmul.mubr.f32.vlgmr.msra.gmra.mxu1 %v6556_v28 }
  0xd1   : > { %5775 = vmatprep.mubr.msk.f32.mxu1 %vm6202_vm3, %v6201_v12 }
  0xd2   : > { %5756 = vmatmul.mubr.f32.gmra.mxu0 %v6618_v48 }
  0xd3   : > { %5758 = vmatprep.mubr.msk.f32.mxu0 %vm6202_vm3, %v6201_v12 }
  0xd4   : > { %5776 = vmatmul.mubr.f32.gmra.mxu1 %v6586_v39 }
  0xd5   : > { %5778 = vmatprep.mubr.msk.f32.mxu1 %vm6202_vm3, %v6201_v12 }
  0xd6   : > { %5759 = vmatmul.mubr.f32.gmra.mxu0 %v6645_v56 }
  0xd7   : > { %5761 = vmatprep.mubr.msk.f32.mxu0 %vm6202_vm3, %v6201_v12 }
  0xd8   : > { %5779 = vmatmul.mubr.f32.gmra.mxu1 %v6618_v48 }
  0xd9   : > { %5781 = vmatprep.mubr.msk.f32.mxu1 %vm6202_vm3, %v6201_v12 }
  0xda   : > { %5762 = vmatmul.mubr.f32.gmra.mxu0 %v6671_v34 }
  0xdc   : > { %5782 = vmatmul.mubr.f32.gmra.mxu1 %v6645_v56 }
  0xdd   : > { %5784 = vmatprep.mubr.msk.f32.mxu1 %vm6202_vm3, %v6201_v12 }
  0xe0   : > { %5785 = vmatmul.mubr.f32.gmra.mxu1 %v6671_v34 }
  0xfe   : > { %v5419_v28 = vpop.f32.mrf.mxu0 }
 0x100   : > { %v582_v33 = vpop.f32.mrf.mxu0 }
 0x102   : > { %v5422_v39 = vpop.f32.mrf.mxu0 }
 0x103   : > { %v5436_v44 = vpop.f32.mrf.mxu1 }
 0x104   : > { %v7007_v47 = vpop.f32.mrf.mxu0  ;;  %v730_v16 = vadd.f32 %v5436_v44, %v5419_v28 }
 0x105   : > { %v723_v48 = vpop.f32.mrf.mxu1 }
 0x106   : > { %v724_v61 = vadd.f32 %v723_v48, %v582_v33 }
 0x107   : > { %v5425_v53 = vpop.f32.mrf.mxu0  ;;  %v5439_v54 = vpop.f32.mrf.mxu1 }
 0x108   : > { %v742_v55 = vadd.f32 %v5439_v54, %v5422_v39 }
 0x109   : > { %v7009_v22 = vpop.f32.mrf.mxu0  ;;  %v7011_v57 = vpop.f32.mrf.mxu1 }
 0x10b   : > { %v5453_v56 = vpop.f32.mrf.mxu0 }
 0x10c   : > { %v841_v23 = vadd.f32 %v5453_v56, %v730_v16  ;;  %v5442_v12 = vpop.f32.mrf.mxu1 }
 0x10d   : > { %v833_v58 = vpop.f32.mrf.mxu0  ;;  %v754_v59 = vadd.f32 %v5442_v12, %v5425_v53 }
 0x10e   : > { %v7013_v62 = vpop.f32.mrf.mxu1  ;;  %v834_v21 = vadd.f32 %v833_v58, %v724_v61 }
 0x10f   : > { %v5456_v63 = vpop.f32.mrf.mxu0 }
 0x110   : > { %v855_v0 = vadd.f32 %v5456_v63, %v742_v55  ;;  %v5470_v34 = vpop.f32.mrf.mxu1 }
 0x111   : > { %v7015_v1 = vpop.f32.mrf.mxu0  ;;  %v954_v2 = vadd.f32 %v5470_v34, %v841_v23 }
 0x112   : > { %v945_v4 = vpop.f32.mrf.mxu1 }
 0x113   : > { %v5459_v3 = vpop.f32.mrf.mxu0  ;;  %v946_v17 = vadd.f32 %v945_v4, %v834_v21 }
 0x114   : > { %v869_v35 = vadd.f32 %v5459_v3, %v754_v59 }
 0x115   : > { %v7017_v5 = vpop.f32.mrf.mxu0  ;;  %v5473_v6 = vpop.f32.mrf.mxu1 }
 0x116   : > { %v970_v60 = vadd.f32 %v5473_v6, %v855_v0 }
 0x117   : > { %v7019_v7 = vpop.f32.mrf.mxu1 }
 0x118   : > { %v5487_v8 = vpop.f32.mrf.mxu0 }
 0x119   : > { %v1075_v9 = vadd.f32 %v5487_v8, %v954_v2 }
 0x11a   : > { %v5476_v13 = vpop.f32.mrf.mxu1  ;;  %v1068_v18 = vpop.f32.mrf.mxu0 }
 0x11b   : > { %v986_v24 = vadd.f32 %v5476_v13, %v869_v35  ;;  %v1069_v32 = vadd.f32 %v1068_v18, %v946_v17 }
 0x11c   : > { %v7021_v26 = vpop.f32.mrf.mxu1  ;;  %v5490_v27 = vpop.f32.mrf.mxu0 }
 0x11d   : > { %v1087_v29 = vadd.f32 %v5490_v27, %v970_v60 }
 0x11e   : > { %v7023_v31 = vpop.f32.mrf.mxu0  ;;  %v5504_v25 = vpop.f32.mrf.mxu1 }
 0x11f   : > { %v7025_v30 = vadd.f32 %v5504_v25, %v1075_v9 }
 0x120   : > { %v1173_v37 = vpop.f32.mrf.mxu1 }
 0x121   : > { %v5493_v10 = vpop.f32.mrf.mxu0  ;;  %v1174_v38 = vadd.f32 %v1173_v37, %v1069_v32 }
 0x122   : > { %v1099_v40 = vadd.f32 %v5493_v10, %v986_v24 }
 0x123   : > { %v7027_v41 = vpop.f32.mrf.mxu0  ;;  %v2546_v11 = vsel %vm2544_vm4, %v1174_v38, 0  ;;  %v5507_v36 = vpop.f32.mrf.mxu1 }
 0x124   : > { %v7030_v42 = vand.u32 4294901760, %v2546_v11  ;;  %v7032_v43 = vadd.f32 %v5507_v36, %v1087_v29 }
 0x125   : > { %v7034_v49 = vpop.f32.mrf.mxu1 }
 0x126   : > { %v7037_v50 = vsub.f32 %v2546_v11, %v7030_v42  ;;  %v7039_v51 = vpop.f32.mrf.mxu0  ;;  %5816 = vmatprep.mubr.f32.mxu1 %v7030_v42 }
 0x128   : > { %v5510_v52 = vpop.f32.mrf.mxu1  ;;  %v5521_v28 = vpop.f32.mrf.mxu0  ;;  %v7618_v33 = vand.u32 4294901760, %v7037_v50 }
 0x129   : > { %v7043_v39 = vadd.f32 %v5510_v52, %v1099_v40 }
 0x12a   : > { %v7045_v44 = vpop.f32.mrf.mxu1  ;;  %v1311_v16 = vpop.f32.mrf.mxu0  ;;  %v2651_v48 = vsub.f32 %v7037_v50, %v7618_v33 }
 0x12c   : > { %v5524_v53 = vpop.f32.mrf.mxu0  ;;  %v1432_v54 = vpop.f32.mrf.mxu1  ;;  %v2652_v55 = vand.u32 4294901760, %v2651_v48 }
 0x12e   : > { %v1321_v56 = vpop.f32.mrf.mxu0  ;;  %v5544_v23 = vpop.f32.mrf.mxu1  ;;  %5797 = vmatprep.mubr.f32.mxu0 %v2652_v55 }
 0x130   : > { %v5527_v12 = vpop.f32.mrf.mxu0  ;;  %v1438_v58 = vpop.f32.mrf.mxu1 }
 0x132   : > { %v1331_v59 = vpop.f32.mrf.mxu0  ;;  %v5547_v63 = vpop.f32.mrf.mxu1 }
 0x134   : > { %v5530_v0 = vpop.f32.mrf.mxu0  ;;  %v1444_v34 = vpop.f32.mrf.mxu1 }
 0x136   : > { %v1341_v2 = vpop.f32.mrf.mxu0  ;;  %v5550_v3 = vpop.f32.mrf.mxu1 }
 0x138   : > { %v5533_v4 = vpop.f32.mrf.mxu0  ;;  %v1450_v35 = vpop.f32.mrf.mxu1 }
 0x139   : > { %v1445_v4 = vadd.f32 %v1444_v34, %v1321_v56 }
 0x13a   : > { %v5553_v6 = vpop.f32.mrf.mxu1  ;;  %v1536_v60 = vpop.f32.mrf.mxu0 }
 0x13c   : > { %v1456_v8 = vpop.f32.mrf.mxu1  ;;  %v5567_v61 = vpop.f32.mrf.mxu0 }
 0x13e   : > { %v5556_v9 = vpop.f32.mrf.mxu1  ;;  %v1543_v13 = vpop.f32.mrf.mxu0 }
 0x13f   : > { %v1451_v9 = vadd.f32 %v1450_v35, %v1331_v59 }
 0x140   : > { %v5570_v18 = vpop.f32.mrf.mxu0  ;;  %v1641_v21 = vpop.f32.mrf.mxu1 }
 0x142   : > { %v1550_v24 = vpop.f32.mrf.mxu0  ;;  %v5590_v27 = vpop.f32.mrf.mxu1 }
 0x143   : > { %v1551_v18 = vadd.f32 %v1550_v24, %v1445_v4 }
 0x144   : > { %v5573_v17 = vpop.f32.mrf.mxu0  ;;  %v1649_v29 = vpop.f32.mrf.mxu1 }
 0x146   : > { %v1557_v25 = vpop.f32.mrf.mxu0  ;;  %v5593_v32 = vpop.f32.mrf.mxu1 }
 0x147   : > { %v1439_v32 = vadd.f32 %v1438_v58, %v1311_v16 }
 0x148   : > { %v5576_v10 = vpop.f32.mrf.mxu0  ;;  %v1657_v37 = vpop.f32.mrf.mxu1 }
 0x149   : > { %v1558_v10 = vadd.f32 %v1557_v25, %v1451_v9  ;;  %v1544_v33 = vadd.f32 %v1543_v13, %v1439_v32 }
 0x14a   : > { %v1564_v40 = vpop.f32.mrf.mxu0  ;;  %v5596_v38 = vpop.f32.mrf.mxu1 }
 0x14b   : > { %v1658_v38 = vadd.f32 %v1657_v37, %v1551_v18  ;;  %v1650_v4 = vadd.f32 %v1649_v29, %v1544_v33 }
 0x14c   : > { %v5579_v11 = vpop.f32.mrf.mxu0  ;;  %v1665_v36 = vpop.f32.mrf.mxu1 }
 0x14d   : > { %v736_v11 = vadd.f32 %v7011_v57, %v7007_v47  ;;  %v748_v47 = vadd.f32 %v7013_v62, %v7009_v22 }
 0x14e   : > { %v5599_v52 = vpop.f32.mrf.mxu1  ;;  %v1756_v28 = vpop.f32.mrf.mxu0 }
 0x14f   : > { %v1433_v52 = vadd.f32 %v1432_v54, %v7039_v51  ;;  %v848_v34 = vadd.f32 %v7015_v1, %v736_v11  ;;  %v862_v1 = vadd.f32 %v7017_v5, %v748_v47 }
 0x150   : > { %v1673_v48 = vpop.f32.mrf.mxu1  ;;  %v5613_v53 = vpop.f32.mrf.mxu0 }
 0x151   : > { %v1537_v59 = vadd.f32 %v1536_v60, %v1433_v52  ;;  %v962_v57 = vadd.f32 %v7019_v7, %v848_v34 }
 0x152   : > { %v5602_v55 = vpop.f32.mrf.mxu1  ;;  %v1762_v23 = vpop.f32.mrf.mxu0 }
 0x153   : > { %v1642_v51 = vadd.f32 %v1641_v21, %v1537_v59  ;;  %v1763_v13 = vadd.f32 %v1762_v23, %v1650_v4  ;;  %v1081_v60 = vadd.f32 %v7023_v31, %v962_v57  ;;  %v978_v23 = vadd.f32 %v7021_v26, %v862_v1 }
 0x154   : > { %v5616_v12 = vpop.f32.mrf.mxu0  ;;  %v1855_v63 = vpop.f32.mrf.mxu1 }
 0x155   : > { %v1457_v12 = vadd.f32 %v1456_v8, %v1341_v2  ;;  %v1186_v5 = vadd.f32 %v7034_v49, %v1081_v60  ;;  %v2561_v60 = vsel %vm2544_vm4, %v7043_v39, 0 }
 0x156   : > { %v1768_v0 = vpop.f32.mrf.mxu0  ;;  %v5636_v3 = vpop.f32.mrf.mxu1 }
 0x157   : > { %v1666_v3 = vadd.f32 %v1665_v36, %v1558_v10  ;;  %v1769_v56 = vadd.f32 %v1768_v0, %v1658_v38  ;;  %v1565_v16 = vadd.f32 %v1564_v40, %v1457_v12  ;;  %v1757_v36 = vadd.f32 %v1756_v28, %v1642_v51 }
 0x158   : > { %v5619_v6 = vpop.f32.mrf.mxu0  ;;  %v1861_v61 = vpop.f32.mrf.mxu1  ;;  %v2552_v38 = vsel %vm2544_vm4, %v1186_v5, 0 }
 0x159   : > { %v1674_v8 = vadd.f32 %v1673_v48, %v1565_v16  ;;  %v1862_v40 = vadd.f32 %v1861_v61, %v1763_v13  ;;  %v1856_v6 = vadd.f32 %v1855_v63, %v1757_v36  ;;  %v2549_v63 = vsel %vm2544_vm4, %v7025_v30, 0 }
 0x15a   : > { %v1774_v27 = vpop.f32.mrf.mxu0  ;;  %v5639_v17 = vpop.f32.mrf.mxu1 }
 0x15b   : > { %v1775_v58 = vadd.f32 %v1774_v27, %v1666_v3  ;;  %v1093_v27 = vadd.f32 %v7027_v41, %v978_v23  ;;  %v2567_v17 = vsel %vm2544_vm4, %v1862_v40, 0  ;;  %v2564_v52 = vsel %vm2544_vm4, %v1856_v6, 0 }
 0x15c   : > { %v5622_v53 = vpop.f32.mrf.mxu0  ;;  %v1867_v55 = vpop.f32.mrf.mxu1  ;;  %v7114_v16 = vand.u32 4294901760, %v2564_v52  ;;  %v7159_v23 = vand.u32 4294901760, %v2561_v60 }
 0x15d   : > { %v1868_v25 = vadd.f32 %v1867_v55, %v1769_v56  ;;  %v1198_v11 = vadd.f32 %v7045_v44, %v1093_v27  ;;  %v7086_v53 = vand.u32 4294901760, %v2567_v17  ;;  %v7101_v44 = vand.u32 4294901760, %v2549_v63 }
 0x15e   : > { %v1780_v35 = vpop.f32.mrf.mxu0  ;;  %v5642_v24 = vpop.f32.mrf.mxu1 }
 0x15f   : > { %v2570_v0 = vsel %vm2544_vm4, %v1868_v25, 0  ;;  %v1781_v22 = vadd.f32 %v1780_v35, %v1674_v8  ;;  %v2555_v35 = vsel %vm2544_vm4, %v7032_v43, 0  ;;  %v7111_v24 = vand.u32 4294901760, %v2552_v38 }
 0x160   : > { %v1873_v54 = vpop.f32.mrf.mxu1  ;;  %v5625_v2 = vpop.f32.mrf.mxu0  ;;  %v7067_v28 = vand.u32 4294901760, %v2570_v0  ;;  %v2558_v4 = vsel %vm2544_vm4, %v1198_v11, 0  ;;  %v7180_v11 = vsub.f32 %v2561_v60, %v7159_v23 }
 0x161   : > { %v1874_v37 = vadd.f32 %v1873_v54, %v1775_v58  ;;  %v7117_v58 = vsub.f32 %v2567_v17, %v7086_v53  ;;  %v7130_v54 = vsub.f32 %v2549_v63, %v7101_v44  ;;  %v7132_v2 = vand.u32 4294901760, %v2555_v35 }
 0x162   : > { %v5645_v33 = vpop.f32.mrf.mxu1  ;;  %v7059_v29 = vpop.f32.mrf.mxu0  ;;  %v7089_v41 = vsub.f32 %v2570_v0, %v7067_v28  ;;  %v7138_v1 = vsub.f32 %v2552_v38, %v7111_v24  ;;  %v7142_v36 = vand.u32 4294901760, %v2558_v4 }
 0x163   : > { %v2573_v62 = vsel %vm2544_vm4, %v1874_v37, 0  ;;  %v7145_v33 = vsub.f32 %v2564_v52, %v7114_v16  ;;  %v2660_v39 = vand.u32 4294901760, %v7130_v54 }
 0x164   : > { %v7063_v7 = vand.u32 4294901760, %v2573_v62  ;;  %v1879_v21 = vpop.f32.mrf.mxu1  ;;  %v5659_v48 = vpop.f32.mrf.mxu0  ;;  %v7124_v57 = vand.u32 4294901760, %v7089_v41 }
 0x165   : > { %v1880_v31 = vadd.f32 %v1879_v21, %v1781_v22  ;;  %v7150_v22 = vand.u32 4294901760, %v7117_v58  ;;  %v7157_v48 = vsub.f32 %v2555_v35, %v7132_v2  ;;  %v2661_v38 = vsub.f32 %v7130_v54, %v2660_v39 }
 0x166   : > { %v7070_v9 = vsub.f32 %v2573_v62, %v7063_v7  ;;  %v5648_v61 = vpop.f32.mrf.mxu1  ;;  %v7072_v18 = vpop.f32.mrf.mxu0  ;;  %v2748_v0 = vsub.f32 %v7089_v41, %v7124_v57 }
 0x167   : > { %v2576_v32 = vsel %vm2544_vm4, %v1880_v31, 0  ;;  %v7165_v31 = vsub.f32 %v2558_v4, %v7142_v36  ;;  %v2670_v61 = vand.u32 4294901760, %v7138_v1  ;;  %v2755_v17 = vsub.f32 %v7117_v58, %v7150_v22 }
 0x168   : > { %v7077_v10 = vand.u32 4294901760, %v2576_v32  ;;  %v7079_v26 = vpop.f32.mrf.mxu1  ;;  %v5662_v49 = vpop.f32.mrf.mxu0  ;;  %v7096_v12 = vand.u32 4294901760, %v7070_v9  ;;  %v2749_v27 = vand.u32 4294901760, %v2748_v0  ;;  %v2680_v52 = vand.u32 4294901760, %v7157_v48 }
 0x169   : > { %v2671_v35 = vsub.f32 %v7138_v1, %v2670_v61  ;;  %v7619_v4 = vand.u32 4294901760, %v7165_v31 }
 0x16a   : > { %v7092_v55 = vsub.f32 %v2576_v32, %v7077_v10  ;;  %5787 = vmatprep.subr.mxu0 %v7077_v10  ;;  %v5682_v30 = vpop.f32.mrf.mxu1  ;;  %v7098_v3 = vpop.f32.mrf.mxu0  ;;  %v2741_v47 = vsub.f32 %v7070_v9, %v7096_v12  ;;  %v7171_v32 = vand.u32 4294901760, %v7145_v33  ;;  %v2681_v60 = vsub.f32 %v7157_v48, %v2680_v52 }
 0x16b   : > { %5788 = vmatpush3.xpose.msra.mxu0 %v7077_v10 }
 0x16c   : > { %5789 = vmatprep.subr.mxu0 %v7063_v7  ;;  %v7105_v56 = vand.u32 4294901760, %v7092_v55  ;;  %v7107_v34 = vpop.f32.mrf.mxu1  ;;  %v5665_v59 = vpop.f32.mrf.mxu0  ;;  %v2742_v40 = vand.u32 4294901760, %v2741_v47  ;;  %v2762_v47 = vsub.f32 %v7145_v33, %v7171_v32 }
 0x16e   : > { %v2734_v25 = vsub.f32 %v7092_v55, %v7105_v56  ;;  %v5685_v51 = vpop.f32.mrf.mxu1  ;;  %v7126_v43 = vpop.f32.mrf.mxu0 }
 0x16f   : > { %5790 = vmatpush3.xpose.msra.mxu0 %v7063_v7 }
 0x170   : > { %5791 = vmatprep.subr.mxu0 %v7067_v28  ;;  %v2735_v8 = vand.u32 4294901760, %v2734_v25  ;;  %v7135_v13 = vpop.f32.mrf.mxu1  ;;  %v5668_v37 = vpop.f32.mrf.mxu0  ;;  %v2756_v25 = vand.u32 4294901760, %v2755_v17  ;;  %v2691_v17 = vsub.f32 %v7165_v31, %v7619_v4 }
 0x171   : > { %v2662_v37 = vand.u32 4294901760, %v2661_v38 }
 0x172   : > { %5806 = vmatprep.subr.mxu1 %v2735_v8  ;;  %v5688_v62 = vpop.f32.mrf.mxu1  ;;  %v7152_v21 = vpop.f32.mrf.mxu0  ;;  %v2692_v4 = vand.u32 4294901760, %v2691_v17 }
 0x173   : > { %5792 = vmatpush3.xpose.msra.mxu0 %v7067_v28  ;;  %5807 = vmatpush3.xpose.msra.mxu1 %v2735_v8 }
 0x174   : > { %5793 = vmatprep.subr.mxu0 %v7086_v53  ;;  %5808 = vmatprep.subr.mxu1 %v2742_v40  ;;  %v7162_v5 = vpop.f32.mrf.mxu1  ;;  %v5671_v6 = vpop.f32.mrf.mxu0 }
 0x175   : > { %v2672_v6 = vand.u32 4294901760, %v2671_v35 }
 0x176   : > { %v5691_v49 = vpop.f32.mrf.mxu1  ;;  %v7173_v63 = vpop.f32.mrf.mxu0 }
 0x177   : > { %5794 = vmatpush3.xpose.msra.mxu0 %v7086_v53  ;;  %5809 = vmatpush3.xpose.msra.mxu1 %v2742_v40  ;;  %v2700_v40 = vand.u32 4294901760, %v7180_v11 }
 0x178   : > { %5795 = vmatprep.subr.mxu0 %v7114_v16  ;;  %5810 = vmatprep.subr.mxu1 %v2749_v27  ;;  %v7184_v30 = vpop.f32.mrf.mxu1  ;;  %v5705_v59 = vpop.f32.mrf.mxu0 }
 0x179   : > { %v2682_v59 = vand.u32 4294901760, %v2681_v60 }
 0x17a   : > { %v5694_v51 = vpop.f32.mrf.mxu1  ;;  %v7192_v8 = vpop.f32.mrf.mxu0 }
 0x17b   : > { %5796 = vmatpush3.xpose.msra.mxu0 %v7114_v16  ;;  %5811 = vmatpush3.xpose.msra.mxu1 %v2749_v27  ;;  %v2763_v27 = vand.u32 4294901760, %v2762_v47  ;;  %v2701_v51 = vsub.f32 %v7180_v11, %v2700_v40 }
 0x17c   : > { %5812 = vmatprep.subr.mxu1 %v2756_v25  ;;  %5825 = vmatprep.subr.mxu0 %v7092_v55  ;;  %v7200_v0 = vpop.f32.mrf.mxu1  ;;  %v5708_v62 = vpop.f32.mrf.mxu0 }
 0x17e   : > { %5798 = vmatmul.mubr.f32.vlgmr.msra.gmra.mxu0 %v2662_v37  ;;  %v5728_v49 = vpop.f32.mrf.mxu1  ;;  %v2211_v38 = vpop.f32.mrf.mxu0 }
 0x17f   : > { %5800 = vmatprep.mubr.f32.mxu0 %v2672_v6  ;;  %5813 = vmatpush3.xpose.msra.mxu1 %v2756_v25 }
 0x180   : > { %5826 = vmatpush3.xpose.msra.mxu0 %v7092_v55  ;;  %5814 = vmatprep.subr.mxu1 %v2763_v27  ;;  %v7209_v62 = vpop.f32.mrf.mxu1  ;;  %v5711_v35 = vpop.f32.mrf.mxu0  ;;  %v2702_v55 = vand.u32 4294901760, %v2701_v51  ;;  %v2112_v51 = vadd.f32 %v7162_v5, %v7126_v43 }
 0x181   : > { %5827 = vmatprep.subr.mxu0 %v7070_v9  ;;  %v2106_v35 = vadd.f32 %v7135_v13, %v7098_v3  ;;  %v2118_v3 = vadd.f32 %v7184_v30, %v7152_v21 }
 0x182   : > { %5801 = vmatmul.mubr.f32.gmra.mxu0 %v2682_v59  ;;  %v5731_v47 = vpop.f32.mrf.mxu1  ;;  %v2218_v37 = vpop.f32.mrf.mxu0 }
 0x183   : > { %5803 = vmatprep.mubr.f32.mxu0 %v2692_v4  ;;  %5815 = vmatpush3.xpose.msra.mxu1 %v2763_v27  ;;  %v2219_v13 = vadd.f32 %v2218_v37, %v2112_v51 }
 0x184   : > { %5828 = vmatpush3.xpose.msra.mxu0 %v7070_v9  ;;  %5844 = vmatprep.subr.mxu1 %v7077_v10  ;;  %v2318_v25 = vpop.f32.mrf.mxu1  ;;  %v5714_v60 = vpop.f32.mrf.mxu0 }
 0x185   : > { %5829 = vmatprep.subr.mxu0 %v7089_v41  ;;  %v2100_v60 = vadd.f32 %v7107_v34, %v7072_v18 }
 0x186   : > { %5804 = vmatmul.mubr.f32.gmra.mxu0 %v2702_v55  ;;  %5817 = vmatmul.mubr.f32.vlgmr.msra.gmra.mxu1 %v7101_v44  ;;  %v5734_v6 = vpop.f32.mrf.mxu1  ;;  %v2225_v49 = vpop.f32.mrf.mxu0 }
 0x187   : > { %5819 = vmatprep.mubr.f32.mxu1 %v7111_v24  ;;  %5835 = vmatprep.mubr.f32.mxu0 %v7037_v50  ;;  %v2205_v18 = vadd.f32 %v7192_v8, %v2100_v60  ;;  %v2226_v30 = vadd.f32 %v2225_v49, %v2118_v3 }
 0x188   : > { %5830 = vmatpush3.xpose.msra.mxu0 %v7089_v41  ;;  %5845 = vmatpush3.xpose.msra.mxu1 %v7077_v10  ;;  %v2326_v9 = vpop.f32.mrf.mxu1  ;;  %v5717_v4 = vpop.f32.mrf.mxu0 }
 0x189   : > { %5831 = vmatprep.subr.mxu0 %v7117_v58  ;;  %5846 = vmatprep.subr.mxu1 %v7063_v7  ;;  %v2327_v21 = vadd.f32 %v2326_v9, %v2219_v13  ;;  %v2311_v8 = vadd.f32 %v7209_v62, %v2205_v18 }
 0x18a   : > { %5820 = vmatmul.mubr.f32.gmra.mxu1 %v7132_v2  ;;  %v5737_v17 = vpop.f32.mrf.mxu1  ;;  %v7223_v27 = vpop.f32.mrf.mxu0 }
 0x18b   : > { %5822 = vmatprep.mubr.f32.mxu1 %v7142_v36 }
 0x18c   : > { %5832 = vmatpush3.xpose.msra.mxu0 %v7117_v58  ;;  %5847 = vmatpush3.xpose.msra.mxu1 %v7063_v7  ;;  %v2334_v41 = vpop.f32.mrf.mxu1  ;;  %v5751_v59 = vpop.f32.mrf.mxu0  ;;  %v7626_v58 = vand.u32 4294901760, %v7037_v50  ;;  %v2094_v50 = vadd.f32 %v7079_v26, %v7059_v29 }
 0x18d   : > { %5833 = vmatprep.subr.mxu0 %v7145_v33  ;;  %5848 = vmatprep.subr.mxu1 %v7067_v28  ;;  %v2335_v49 = vadd.f32 %v2334_v41, %v2226_v30 }
 0x18e   : > { %5823 = vmatmul.mubr.f32.gmra.mxu1 %v7159_v23  ;;  %v5740_v47 = vpop.f32.mrf.mxu1  ;;  %v2423_v55 = vpop.f32.mrf.mxu0  ;;  %v2198_v29 = vadd.f32 %v7173_v63, %v2094_v50 }
 0x18f   : > { %5854 = vmatprep.mubr.f32.mxu1 %v7626_v58 }
 0x190   : > { %5834 = vmatpush3.xpose.msra.mxu0 %v7145_v33  ;;  %5849 = vmatpush3.xpose.msra.mxu1 %v7067_v28  ;;  %v7241_v6 = vpop.f32.mrf.mxu1  ;;  %v5754_v43 = vpop.f32.mrf.mxu0  ;;  %v2212_v33 = vadd.f32 %v2211_v38, %v2106_v35  ;;  %v2303_v63 = vadd.f32 %v7200_v0, %v2198_v29 }
 0x191   : > { %5850 = vmatprep.subr.mxu1 %v7086_v53  ;;  %5863 = vmatprep.subr.mxu0 %v7105_v56 }
 0x192   : > { %v5774_v5 = vpop.f32.mrf.mxu1  ;;  %v2429_v4 = vpop.f32.mrf.mxu0  ;;  %v2319_v26 = vadd.f32 %v2318_v25, %v2212_v33 }
 0x193   : > { %5836 = vmatmul.mubr.f32.vlgmr.msra.gmra.mxu0 %v7130_v54  ;;  %v2418_v54 = vadd.f32 %v7223_v27, %v2303_v63 }
 0x194   : > { %5838 = vmatprep.mubr.f32.mxu0 %v7138_v1  ;;  %5851 = vmatpush3.xpose.msra.mxu1 %v7086_v53  ;;  %v2522_v34 = vpop.f32.mrf.mxu1  ;;  %v5757_v17 = vpop.f32.mrf.mxu0  ;;  %v2430_v25 = vadd.f32 %v2429_v4, %v2319_v26 }
 0x195   : > { %5864 = vmatpush3.xpose.msra.mxu0 %v7105_v56  ;;  %5852 = vmatprep.subr.mxu1 %v7114_v16  ;;  %v2517_v27 = vadd.f32 %v7241_v6, %v2418_v54 }
 0x196   : > { %5865 = vmatprep.subr.mxu0 %v7096_v12  ;;  %v5777_v38 = vpop.f32.mrf.mxu1  ;;  %v2435_v37 = vpop.f32.mrf.mxu0 }
 0x197   : > { %5839 = vmatmul.mubr.f32.gmra.mxu0 %v7157_v48  ;;  %v2436_v9 = vadd.f32 %v2435_v37, %v2327_v21 }
 0x198   : > { %5841 = vmatprep.mubr.f32.mxu0 %v7165_v31  ;;  %5853 = vmatpush3.xpose.msra.mxu1 %v7114_v16  ;;  %v2528_v56 = vpop.f32.mrf.mxu1  ;;  %v5760_v59 = vpop.f32.mrf.mxu0 }
 0x199   : > { %5866 = vmatpush3.xpose.msra.mxu0 %v7096_v12  ;;  %5882 = vmatprep.subr.mxu1 %v7077_v10  ;;  %v2424_v12 = vadd.f32 %v2423_v55, %v2311_v8  ;;  %v7627_v55 = vand.u32 4294901760, %v7165_v31 }
 0x19a   : > { %5867 = vmatprep.subr.mxu0 %v7124_v57  ;;  %v5780_v51 = vpop.f32.mrf.mxu1  ;;  %v2441_v35 = vpop.f32.mrf.mxu0 }
 0x19b   : > { %5842 = vmatmul.mubr.f32.gmra.mxu0 %v7180_v11  ;;  %5855 = vmatmul.mubr.f32.vlgmr.msra.gmra.mxu1 %v2660_v39  ;;  %v2442_v47 = vadd.f32 %v2441_v35, %v2335_v49  ;;  %v2529_v39 = vadd.f32 %v2528_v56, %v2430_v25  ;;  %v7305_v11 = vand.u32 4294901760, %v2517_v27 }
 0x19c   : > { %5857 = vmatprep.mubr.f32.mxu1 %v2670_v61  ;;  %5873 = vmatprep.mubr.f32.mxu0 %v7030_v42  ;;  %v2534_v62 = vpop.f32.mrf.mxu1  ;;  %v5763_v41 = vpop.f32.mrf.mxu0 }
 0x19d   : > { %5868 = vmatpush3.xpose.msra.mxu0 %v7124_v57  ;;  %5883 = vmatpush3.xpose.msra.mxu1 %v7077_v10  ;;  %v2535_v0 = vadd.f32 %v2534_v62, %v2436_v9  ;;  %v2523_v57 = vadd.f32 %v2522_v34, %v2424_v12  ;;  %v7287_v48 = vand.u32 4294901760, %v2529_v39  ;;  %v7327_v43 = vsub.f32 %v2517_v27, %v7305_v11 }
 0x19e   : > { %5869 = vmatprep.subr.mxu0 %v7150_v22  ;;  %5884 = vmatprep.subr.mxu1 %v7063_v7  ;;  %v5783_v1 = vpop.f32.mrf.mxu1 }
 0x19f   : > { %5858 = vmatmul.mubr.f32.gmra.mxu1 %v2680_v52  ;;  %v7278_v61 = vand.u32 4294901760, %v2535_v0  ;;  %v7346_v5 = vand.u32 4294901760, %v7327_v43 }
 0x1a0   : > { %5860 = vmatprep.mubr.f32.mxu1 %v7627_v55  ;;  %v2540_v10 = vpop.f32.mrf.mxu1 }
 0x1a1   : > { %5870 = vmatpush3.xpose.msra.mxu0 %v7150_v22  ;;  %5885 = vmatpush3.xpose.msra.mxu1 %v7063_v7  ;;  %v2541_v58 = vadd.f32 %v2540_v10, %v2442_v47  ;;  %v7292_v31 = vsub.f32 %v2535_v0, %v7278_v61  ;;  %v7297_v7 = vand.u32 4294901760, %v2523_v57  ;;  %v3566_v34 = vsub.f32 %v7327_v43, %v7346_v5 }
 0x1a2   : > { %5871 = vmatprep.subr.mxu0 %v7171_v32  ;;  %5886 = vmatprep.subr.mxu1 %v7067_v28  ;;  %v5786_v52 = vpop.f32.mrf.mxu1 }
 0x1a3   : > { %5861 = vmatmul.mubr.f32.gmra.mxu1 %v2700_v40  ;;  %v7294_v60 = vand.u32 4294901760, %v2541_v58  ;;  %v7308_v40 = vsub.f32 %v2529_v39, %v7287_v48  ;;  %v7315_v6 = vand.u32 4294901760, %v7292_v31 }
 0x1a4   : > { %5892 = vmatprep.mubr.f32.mxu1 %v7030_v42 }
 0x1a5   : > { %5872 = vmatpush3.xpose.msra.mxu0 %v7171_v32  ;;  %5887 = vmatpush3.xpose.msra.mxu1 %v7067_v28  ;;  %v7302_v22 = vsub.f32 %v2541_v58, %v7294_v60  ;;  %v7319_v28 = vsub.f32 %v2523_v57, %v7297_v7  ;;  %v7331_v3 = vand.u32 4294901760, %v7308_v40  ;;  %v3545_v50 = vsub.f32 %v7292_v31, %v7315_v6 }
 0x1a6   : > { %5888 = vmatprep.subr.mxu1 %v7086_v53  ;;  %5901 = vmatprep.subr.mxu0 %v7294_v60 }
 0x1a7   : > { %v7312_v42 = vand.u32 4294901760, %v7302_v22  ;;  %v3552_v33 = vsub.f32 %v7308_v40, %v7331_v3  ;;  %v3546_v4 = vand.u32 4294901760, %v3545_v50 }
 0x1a8   : > { %5874 = vmatmul.mubr.f32.vlgmr.msra.gmra.mxu0 %v7101_v44 }
 0x1a9   : > { %5876 = vmatprep.mubr.f32.mxu0 %v7111_v24  ;;  %5889 = vmatpush3.xpose.msra.mxu1 %v7086_v53  ;;  %v3538_v32 = vsub.f32 %v7302_v22, %v7312_v42  ;;  %v7338_v53 = vand.u32 4294901760, %v7319_v28 }
 0x1aa   : > { %5890 = vmatprep.subr.mxu1 %v7114_v16  ;;  %5902 = vmatpush3.msra.mxu0 %v7294_v60 }
 0x1ab   : > { %5903 = vmatprep.subr.mxu0 %v7278_v61  ;;  %v3539_v13 = vand.u32 4294901760, %v3538_v32  ;;  %v3559_v18 = vsub.f32 %v7319_v28, %v7338_v53 }
 0x1ac   : > { %5877 = vmatmul.mubr.f32.gmra.mxu0 %v7132_v2 }
 0x1ad   : > { %5879 = vmatprep.mubr.f32.mxu0 %v7142_v36  ;;  %5891 = vmatpush3.xpose.msra.mxu1 %v7114_v16  ;;  %v3553_v16 = vand.u32 4294901760, %v3552_v33 }
 0x1ae   : > { %5904 = vmatpush3.msra.mxu0 %v7278_v61  ;;  %5920 = vmatprep.subr.mxu1 %v3539_v13 }
 0x1af   : > { %5905 = vmatprep.subr.mxu0 %v7287_v48 }
 0x1b0   : > { %5880 = vmatmul.mubr.f32.gmra.mxu0 %v7159_v23  ;;  %5893 = vmatmul.mubr.f32.vlgmr.msra.gmra.mxu1 %v7101_v44  ;;  %v3560_v44 = vand.u32 4294901760, %v3559_v18 }
 0x1b1   : > { %5895 = vmatprep.mubr.f32.mxu1 %v7111_v24  ;;  %5906 = vmatpush3.msra.mxu0 %v7287_v48  ;;  %v3567_v24 = vand.u32 4294901760, %v3566_v34 }
 0x1b2   : > { %5921 = vmatpush3.msra.mxu1 %v3539_v13  ;;  %5907 = vmatprep.subr.mxu0 %v7297_v7 }
 0x1b3   : > { %5922 = vmatprep.subr.mxu1 %v3546_v4  ;;  %5908 = vmatpush3.msra.mxu0 %v7297_v7 }
 0x1b4   : > { %5896 = vmatmul.mubr.f32.gmra.mxu1 %v7132_v2  ;;  %5909 = vmatprep.subr.mxu0 %v7305_v11 }
 0x1b5   : > { %5898 = vmatprep.mubr.f32.mxu1 %v7142_v36  ;;  %5923 = vmatpush3.msra.mxu1 %v3546_v4 }
 0x1b6   : > { %5924 = vmatprep.subr.mxu1 %v3553_v16  ;;  %5910 = vmatpush3.msra.mxu0 %v7305_v11 }
 0x1b7   : > { %5925 = vmatpush3.msra.mxu1 %v3553_v16  ;;  %5939 = vmatprep.subr.mxu0 %v7302_v22 }
 0x1b8   : > { %5899 = vmatmul.mubr.f32.gmra.mxu1 %v7159_v23  ;;  %5926 = vmatprep.subr.mxu1 %v3560_v44 }
 0x1b9   : > { %5927 = vmatpush3.msra.mxu1 %v3560_v44 }
 0x1ba   : > { %5928 = vmatprep.subr.mxu1 %v3567_v24 }
 0x1bb   : > { %5929 = vmatpush3.msra.mxu1 %v3567_v24 }
 0x1bc   : > { %5958 = vmatprep.subr.mxu1 %v7294_v60 }
 0x23e   : > { %v5799_v2 = vpop.f32.mrf.mxu0 }
 0x240   : > { %v2654_v17 = vpop.f32.mrf.mxu0 }
 0x242   : > { %v5802_v21 = vpop.f32.mrf.mxu0 }
 0x244   : > { %v2674_v30 = vpop.f32.mrf.mxu0 }
 0x246   : > { %v5818_v36 = vpop.f32.mrf.mxu1  ;;  %v5805_v26 = vpop.f32.mrf.mxu0 }
 0x247   : > { %v2807_v47 = vadd.f32 %v5818_v36, %v5799_v2 }
 0x248   : > { %v2800_v29 = vpop.f32.mrf.mxu1  ;;  %v2694_v37 = vpop.f32.mrf.mxu0 }
 0x249   : > { %v2801_v1 = vadd.f32 %v2800_v29, %v2654_v17 }
 0x24a   : > { %v5821_v38 = vpop.f32.mrf.mxu1 }
 0x24b   : > { %v2819_v32 = vadd.f32 %v5821_v38, %v5802_v21 }
 0x24c   : > { %v2812_v8 = vpop.f32.mrf.mxu1 }
 0x24d   : > { %v2813_v13 = vadd.f32 %v2812_v8, %v2674_v30 }
 0x24e   : > { %v5824_v59 = vpop.f32.mrf.mxu1 }
 0x24f   : > { %v2831_v44 = vadd.f32 %v5824_v59, %v5805_v26 }
 0x250   : > { %v2824_v23 = vpop.f32.mrf.mxu1 }
 0x251   : > { %v2825_v46 = vadd.f32 %v2824_v23, %v2694_v37 }
 0x253   : > { %v5837_v56 = vpop.f32.mrf.mxu0 }
 0x254   : > { %v2920_v55 = vadd.f32 %v5837_v56, %v2807_v47 }
 0x255   : > { %v2912_v49 = vpop.f32.mrf.mxu0 }
 0x256   : > { %v2913_v10 = vadd.f32 %v2912_v49, %v2801_v1 }
 0x257   : > { %v5840_v9 = vpop.f32.mrf.mxu0 }
 0x258   : > { %v2934_v18 = vadd.f32 %v5840_v9, %v2819_v32 }
 0x259   : > { %v2926_v25 = vpop.f32.mrf.mxu0 }
 0x25a   : > { %v2927_v16 = vadd.f32 %v2926_v25, %v2813_v13 }
 0x25b   : > { %v5856_v63 = vpop.f32.mrf.mxu1  ;;  %v5843_v35 = vpop.f32.mrf.mxu0 }
 0x25c   : > { %v3034_v58 = vadd.f32 %v5856_v63, %v2920_v55  ;;  %v2948_v49 = vadd.f32 %v5843_v35, %v2831_v44 }
 0x25d   : > { %v3025_v51 = vpop.f32.mrf.mxu1  ;;  %v2940_v62 = vpop.f32.mrf.mxu0 }
 0x25e   : > { %v3026_v50 = vadd.f32 %v3025_v51, %v2913_v10  ;;  %v2941_v47 = vadd.f32 %v2940_v62, %v2825_v46 }
 0x25f   : > { %v5859_v12 = vpop.f32.mrf.mxu1 }
 0x260   : > { %v3050_v17 = vadd.f32 %v5859_v12, %v2934_v18 }
 0x261   : > { %v3041_v41 = vpop.f32.mrf.mxu1 }
 0x262   : > { %v3042_v29 = vadd.f32 %v3041_v41, %v2927_v16 }
 0x263   : > { %v5862_v54 = vpop.f32.mrf.mxu1 }
 0x264   : > { %v3066_v38 = vadd.f32 %v5862_v54, %v2948_v49 }
 0x265   : > { %v3057_v27 = vpop.f32.mrf.mxu1 }
 0x266   : > { %v3058_v25 = vadd.f32 %v3057_v27, %v2941_v47 }
 0x268   : > { %v5875_v0 = vpop.f32.mrf.mxu0 }
 0x269   : > { %v3158_v33 = vadd.f32 %v5875_v0, %v3034_v58 }
 0x26a   : > { %v3151_v39 = vpop.f32.mrf.mxu0 }
 0x26b   : > { %v3152_v34 = vadd.f32 %v3151_v39, %v3026_v50 }
 0x26c   : > { %v5878_v57 = vpop.f32.mrf.mxu0 }
 0x26d   : > { %v3170_v1 = vadd.f32 %v5878_v57, %v3050_v17 }
 0x26e   : > { %v3163_v52 = vpop.f32.mrf.mxu0 }
 0x26f   : > { %v3164_v21 = vadd.f32 %v3163_v52, %v3042_v29 }
 0x270   : > { %v5894_v4 = vpop.f32.mrf.mxu1  ;;  %v5881_v24 = vpop.f32.mrf.mxu0 }
 0x271   : > { %v3264_v2 = vadd.f32 %v5894_v4, %v3158_v33  ;;  %v3182_v23 = vadd.f32 %v5881_v24, %v3066_v38 }
 0x272   : > { %v3257_v36 = vpop.f32.mrf.mxu1  ;;  %v3175_v51 = vpop.f32.mrf.mxu0 }
 0x273   : > { %v3258_v56 = vadd.f32 %v3257_v36, %v3152_v34  ;;  %v3292_v8 = vmul.f32 0.35355338, %v3264_v2  ;;  %v3176_v12 = vadd.f32 %v3175_v51, %v3058_v25 }
 0x274   : > { %v5897_v63 = vpop.f32.mrf.mxu1 }
 0x275   : > { %v3291_v30 = vmul.f32 0.35355338, %v3258_v56  ;;  %v3276_v26 = vadd.f32 %v5897_v63, %v3170_v1  ;;  %v3301_v46 = vsel %vm3297_vm5, %v3292_v8, -inf }
 0x276   : > { %v3269_v9 = vpop.f32.mrf.mxu1 }
 0x277   : > { %v3270_v59 = vadd.f32 %v3269_v9, %v3164_v21  ;;  %v3298_v0 = vsel %vm3297_vm5, %v3291_v30, -inf  ;;  %v3294_v62 = vmul.f32 0.35355338, %v3276_v26 }
 0x278   : > { %v5900_v37 = vpop.f32.mrf.mxu1  ;;  %3299 = vmax.xlane.f32.xlu0 %v3298_v0 }
 0x279   : > { %v3293_v35 = vmul.f32 0.35355338, %v3270_v59  ;;  %v3288_v39 = vadd.f32 %v5900_v37, %v3182_v23  ;;  %v3307_v58 = vsel %vm3297_vm5, %v3294_v62, -inf }
 0x27a   : > { %v3281_v41 = vpop.f32.mrf.mxu1 }
 0x27b   : > { %v3282_v54 = vadd.f32 %v3281_v41, %v3176_v12  ;;  %v3304_v55 = vsel %vm3297_vm5, %v3293_v35, -inf  ;;  %v3296_v10 = vmul.f32 0.35355338, %v3288_v39 }
 0x27c   : > { %3305 = vmax.xlane.f32.xlu1 %v3304_v55  ;;  %3302 = vmax.xlane.f32.xlu0 %v3301_v46 }
 0x27d   : > { %v3295_v57 = vmul.f32 0.35355338, %v3282_v54  ;;  %v3313_v52 = vsel %vm3297_vm5, %v3296_v10, -inf }
 0x27f   : > { %v3310_v27 = vsel %vm3297_vm5, %v3295_v57, -inf }
 0x280   : > { %3308 = vmax.xlane.f32.xlu1 %v3307_v58  ;;  %3311 = vmax.xlane.f32.xlu0 %v3310_v27 }
 0x284   : > { %3314 = vmax.xlane.f32.xlu1 %v3313_v52 }
 0x301   : > { %v3300_v32 = vpop.xlane.xlu0 %3299 }
 0x302   : > { %v3316_v13 = vsub.f32 %v3291_v30, %v3300_v32 }
 0x304   : > { %v3322_v50 = vmul.f32 1.442695, %v3316_v13 }
 0x305   : > { %v3306_v33 = vpop.xlane.xlu1 %3305  ;;  %v3303_v4 = vpop.xlane.xlu0 %3302 }
 0x306   : > { %6124 = vpow2.f32 %v3322_v50  ;;  %v3318_v18 = vsub.f32 %v3293_v35, %v3306_v33  ;;  %v3317_v16 = vsub.f32 %v3292_v8, %v3303_v4 }
 0x308   : > { %v3326_v34 = vmul.f32 1.442695, %v3318_v18  ;;  %v3324_v44 = vmul.f32 1.442695, %v3317_v16 }
 0x309   : > { %v3309_v24 = vpop.xlane.xlu1 %3308  ;;  %v3312_v2 = vpop.xlane.xlu0 %3311 }
 0x30a   : > { %6126 = vpow2.f32 %v3326_v34  ;;  %v3319_v36 = vsub.f32 %v3294_v62, %v3309_v24  ;;  %v3320_v17 = vsub.f32 %v3295_v57, %v3312_v2 }
 0x30b   : > { %6128 = vpow2.f32 %v3324_v44 }
 0x30c   : > { %v3328_v29 = vmul.f32 1.442695, %v3319_v36  ;;  %v3330_v56 = vmul.f32 1.442695, %v3320_v17 }
 0x30d   : > { %v3315_v49 = vpop.xlane.xlu1 %3314 }
 0x30e   : > { %6130 = vpow2.f32 %v3328_v29  ;;  %v3321_v63 = vsub.f32 %v3296_v10, %v3315_v49 }
 0x30f   : > { %6132 = vpow2.f32 %v3330_v56 }
 0x310   : > { %v3332_v47 = vmul.f32 1.442695, %v3321_v63 }
 0x312   : > { %6134 = vpow2.f32 %v3332_v47 }
 0x313   : > { %v6125_v1 = vpop.eup %6124 }
 0x314   : > { %v3334_v21 = vsel %vm3297_vm5, %v6125_v1, 0.0 }
 0x315   : > { %3335 = vadd.xlane.f32.xlu0 %v3334_v21 }
 0x317   : > { %v6127_v30 = vpop.eup %6126 }
 0x318   : > { %v6129_v38 = vpop.eup %6128  ;;  %v3340_v8 = vsel %vm3297_vm5, %v6127_v30, 0.0 }
 0x319   : > { %v3337_v51 = vsel %vm3297_vm5, %v6129_v38, 0.0  ;;  %3341 = vadd.xlane.f32.xlu0 %v3340_v8 }
 0x31a   : > { %3338 = vadd.xlane.f32.xlu1 %v3337_v51 }
 0x31b   : > { %v6131_v9 = vpop.eup %6130 }
 0x31c   : > { %v6133_v25 = vpop.eup %6132  ;;  %v3343_v26 = vsel %vm3297_vm5, %v6131_v9, 0.0 }
 0x31d   : > { %v3346_v59 = vsel %vm3297_vm5, %v6133_v25, 0.0 }
 0x31e   : > { %3344 = vadd.xlane.f32.xlu1 %v3343_v26  ;;  %3347 = vadd.xlane.f32.xlu0 %v3346_v59 }
 0x31f   : > { %v6135_v0 = vpop.eup %6134 }
 0x320   : > { %v3349_v37 = vsel %vm3297_vm5, %v6135_v0, 0.0 }
 0x322   : > { %3350 = vadd.xlane.f32.xlu1 %v3349_v37 }
 0x39e   : > { %v3336_v23 = vpop.xlane.xlu0 %3335 }
 0x39f   : > { %6136 = vrcp.f32 %v3336_v23 }
 0x3a2   : > { %v3342_v12 = vpop.xlane.xlu0 %3341 }
 0x3a3   : > { %v3339_v35 = vpop.xlane.xlu1 %3338  ;;  %6138 = vrcp.f32 %v3342_v12 }
 0x3a4   : > { %6140 = vrcp.f32 %v3339_v35 }
 0x3a7   : > { %v3345_v41 = vpop.xlane.xlu1 %3344  ;;  %v3348_v46 = vpop.xlane.xlu0 %3347 }
 0x3a8   : > { %6142 = vrcp.f32 %v3345_v41 }
 0x3a9   : > { %6144 = vrcp.f32 %v3348_v46 }
 0x3ab   : > { %v3351_v62 = vpop.xlane.xlu1 %3350 }
 0x3ac   : > { %v6137_v39 = vpop.eup %6136  ;;  %6146 = vrcp.f32 %v3351_v62 }
 0x3ad   : > { %v3353_v54 = vmul.f32 %v6137_v39, %v6125_v1 }
 0x3af   : > { %v3365_v55 = vsel %vm3297_vm5, %v3353_v54, 0 }
 0x3b0   : > { %v6139_v57 = vpop.eup %6138  ;;  %v7379_v10 = vand.u32 4294901760, %v3365_v55 }
 0x3b1   : > { %v6141_v58 = vpop.eup %6140  ;;  %v3357_v27 = vmul.f32 %v6139_v57, %v6127_v30 }
 0x3b2   : > { %v3355_v52 = vmul.f32 %v6141_v58, %v6129_v38  ;;  %5930 = vmatprep.mubr.f32.mxu1 %v7379_v10  ;;  %v7383_v32 = vsub.f32 %v3365_v55, %v7379_v10 }
 0x3b3   : > { %v3371_v13 = vsel %vm3297_vm5, %v3357_v27, 0 }
 0x3b4   : > { %v3368_v50 = vsel %vm3297_vm5, %v3355_v52, 0  ;;  %v7387_v33 = vand.u32 4294901760, %v3371_v13  ;;  %v3454_v4 = vand.u32 4294901760, %v7383_v32 }
 0x3b5   : > { %v6143_v18 = vpop.eup %6142  ;;  %v7390_v16 = vand.u32 4294901760, %v3368_v50 }
 0x3b6   : > { %v6145_v34 = vpop.eup %6144  ;;  %v3455_v44 = vsub.f32 %v7383_v32, %v3454_v4  ;;  %v3359_v24 = vmul.f32 %v6143_v18, %v6131_v9  ;;  %v7394_v2 = vsub.f32 %v3371_v13, %v7387_v33 }
 0x3b7   : > { %v7397_v36 = vsub.f32 %v3368_v50, %v7390_v16  ;;  %5931 = vmatmul.mubr.f32.vlgmr.msra.gmra.mxu1 %v7390_v16  ;;  %v3361_v17 = vmul.f32 %v6145_v34, %v6133_v25 }
 0x3b8   : > { %5959 = vmatpush3.msra.mxu1 %v7294_v60  ;;  %5933 = vmatprep.mubr.f32.mxu1 %v7387_v33  ;;  %v3456_v29 = vand.u32 4294901760, %v3455_v44  ;;  %v3374_v56 = vsel %vm3297_vm5, %v3359_v24, 0  ;;  %v3474_v49 = vand.u32 4294901760, %v7394_v2 }
 0x3b9   : > { %v6147_v63 = vpop.eup %6146  ;;  %5960 = vmatprep.subr.mxu1 %v7278_v61  ;;  %v7405_v47 = vand.u32 4294901760, %v3374_v56  ;;  %v3377_v1 = vsel %vm3297_vm5, %v3361_v17, 0  ;;  %v3464_v21 = vand.u32 4294901760, %v7397_v36 }
 0x3ba   : > { %5961 = vmatpush3.msra.mxu1 %v7278_v61  ;;  %5911 = vmatprep.mubr.f32.mxu0 %v3456_v29  ;;  %v7410_v30 = vand.u32 4294901760, %v3377_v1  ;;  %v3363_v38 = vmul.f32 %v6147_v63, %v6135_v0  ;;  %v3475_v8 = vsub.f32 %v7394_v2, %v3474_v49 }
 0x3bb   : > { %5962 = vmatprep.subr.mxu1 %v7287_v48  ;;  %5934 = vmatmul.mubr.f32.gmra.mxu1 %v7405_v47  ;;  %v3465_v51 = vsub.f32 %v7397_v36, %v3464_v21  ;;  %v3483_v9 = vsub.f32 %v3374_v56, %v7405_v47 }
 0x3bc   : > { %5963 = vmatpush3.msra.mxu1 %v7287_v48  ;;  %5936 = vmatprep.mubr.f32.mxu1 %v7410_v30  ;;  %v3380_v25 = vsel %vm3297_vm5, %v3363_v38, 0  ;;  %v3493_v26 = vsub.f32 %v3377_v1, %v7410_v30  ;;  %v3476_v37 = vand.u32 4294901760, %v3475_v8 }
 0x3bd   : > { %5964 = vmatprep.subr.mxu1 %v7297_v7  ;;  %v3466_v59 = vand.u32 4294901760, %v3465_v51  ;;  %v7422_v0 = vand.u32 4294901760, %v3380_v25  ;;  %v3484_v23 = vand.u32 4294901760, %v3483_v9 }
 0x3be   : > { %5965 = vmatpush3.msra.mxu1 %v7297_v7  ;;  %v3494_v12 = vand.u32 4294901760, %v3493_v26 }
 0x3bf   : > { %5966 = vmatprep.subr.mxu1 %v7305_v11  ;;  %5912 = vmatmul.mubr.f32.vlgmr.msra.gmra.mxu0 %v3466_v59  ;;  %v3485_v35 = vsub.f32 %v3483_v9, %v3484_v23  ;;  %v3503_v41 = vsub.f32 %v3380_v25, %v7422_v0 }
 0x3c0   : > { %5937 = vmatmul.mubr.f32.gmra.mxu1 %v7422_v0  ;;  %5940 = vmatpush3.msra.mxu0 %v7302_v22  ;;  %v3495_v46 = vsub.f32 %v3493_v26, %v3494_v12 }
 0x3c1   : > { %5967 = vmatpush3.msra.mxu1 %v7305_v11  ;;  %5914 = vmatprep.mubr.f32.mxu0 %v3476_v37  ;;  %v3486_v62 = vand.u32 4294901760, %v3485_v35  ;;  %v3504_v39 = vand.u32 4294901760, %v3503_v41 }
 0x3c2   : > { %5941 = vmatprep.subr.mxu0 %v7292_v31  ;;  %5968 = vmatprep.mubr.f32.mxu1 %v3454_v4  ;;  %v3496_v54 = vand.u32 4294901760, %v3495_v46 }
 0x3c3   : > { %5996 = vmatprep.subr.mxu1 %v7294_v60  ;;  %5942 = vmatpush3.msra.mxu0 %v7292_v31  ;;  %v3505_v55 = vsub.f32 %v3503_v41, %v3504_v39 }
 0x3c4   : > { %5943 = vmatprep.subr.mxu0 %v7308_v40  ;;  %5915 = vmatmul.mubr.f32.gmra.mxu0 %v3486_v62 }
 0x3c5   : > { %5944 = vmatpush3.msra.mxu0 %v7308_v40  ;;  %5969 = vmatmul.mubr.f32.vlgmr.msra.gmra.mxu1 %v3464_v21  ;;  %v3506_v22 = vand.u32 4294901760, %v3505_v55 }
 0x3c6   : > { %5997 = vmatpush3.msra.mxu1 %v7294_v60  ;;  %5917 = vmatprep.mubr.f32.mxu0 %v3496_v54 }
 0x3c7   : > { %5945 = vmatprep.subr.mxu0 %v7319_v28  ;;  %5971 = vmatprep.mubr.f32.mxu1 %v3474_v49 }
 0x3c8   : > { %5998 = vmatprep.subr.mxu1 %v7278_v61  ;;  %5946 = vmatpush3.msra.mxu0 %v7319_v28 }
 0x3c9   : > { %5999 = vmatpush3.msra.mxu1 %v7278_v61  ;;  %5947 = vmatprep.subr.mxu0 %v7327_v43  ;;  %v4101_v61 = vld [vmem:[%s6295_s23] sm:$0xff] }
 0x3ca   : > { %6000 = vmatprep.subr.mxu1 %v7287_v48  ;;  %5918 = vmatmul.mubr.f32.gmra.mxu0 %v3506_v22 }
 0x3cb   : > { %5948 = vmatpush3.msra.mxu0 %v7327_v43  ;;  %5972 = vmatmul.mubr.f32.gmra.mxu1 %v3484_v23 }
 0x3cc   : > { %6001 = vmatpush3.msra.mxu1 %v7287_v48  ;;  %5949 = vmatprep.mubr.f32.mxu0 %v7383_v32  ;;  %v7474_v48 = vand.u32 4294901760, %v4101_v61 }
 0x3cd   : > { %5974 = vmatprep.mubr.f32.mxu1 %v3494_v12  ;;  %5977 = vmatprep.subr.mxu0 %v7312_v42 }
 0x3ce   : > { %6002 = vmatprep.subr.mxu1 %v7297_v7  ;;  %5950 = vmatmul.mubr.f32.vlgmr.msra.gmra.mxu0 %v7397_v36  ;;  %v7478_v31 = vsub.f32 %v4101_v61, %v7474_v48 }
 0x3cf   : > { %6003 = vmatpush3.msra.mxu1 %v7297_v7  ;;  %5978 = vmatpush3.msra.mxu0 %v7312_v42 }
 0x3d0   : > { %6004 = vmatprep.subr.mxu1 %v7305_v11  ;;  %5975 = vmatmul.mubr.f32.gmra.mxu1 %v3504_v39  ;;  %v7482_v60 = vand.u32 4294901760, %v7478_v31 }
 0x3d1   : > { %6005 = vmatpush3.msra.mxu1 %v7305_v11  ;;  %5952 = vmatprep.mubr.f32.mxu0 %v7394_v2 }
 0x3d2   : > { %5979 = vmatprep.subr.mxu0 %v7315_v6  ;;  %6006 = vmatprep.mubr.f32.mxu1 %v7379_v10  ;;  %v4280_v7 = vsub.f32 %v7478_v31, %v7482_v60 }
 0x3d3   : > { %5980 = vmatpush3.msra.mxu0 %v7315_v6 }
 0x3d4   : > { %5981 = vmatprep.subr.mxu0 %v7331_v3  ;;  %5953 = vmatmul.mubr.f32.gmra.mxu0 %v3483_v9  ;;  %v4281_v11 = vand.u32 4294901760, %v4280_v7 }
 0x3d5   : > { %5982 = vmatpush3.msra.mxu0 %v7331_v3  ;;  %6007 = vmatmul.mubr.f32.vlgmr.msra.gmra.mxu1 %v7390_v16 }
 0x3d6   : > { %5955 = vmatprep.mubr.f32.mxu0 %v3493_v26  ;;  %5983 = vmatprep.subr.mxu0 %v7338_v53 }
 0x3d7   : > { %6009 = vmatprep.mubr.f32.mxu1 %v7387_v33  ;;  %5984 = vmatpush3.msra.mxu0 %v7338_v53 }
 0x3d8   : > { %5985 = vmatprep.subr.mxu0 %v7346_v5  ;;  %5956 = vmatmul.mubr.f32.gmra.mxu0 %v3503_v41 }
 0x3d9   : > { %5986 = vmatpush3.msra.mxu0 %v7346_v5  ;;  %6010 = vmatmul.mubr.f32.gmra.mxu1 %v7405_v47 }
 0x3da   : > { %5987 = vmatprep.mubr.f32.mxu0 %v7379_v10  ;;  %6012 = vmatprep.mubr.f32.mxu1 %v7410_v30 }
 0x3db   : > { %6015 = vmatprep.subr.mxu0 %v7474_v48  ;;  %6026 = vmatprep.subr.mxu1 %v4281_v11 }
 0x3dc   : > { %5988 = vmatmul.mubr.f32.vlgmr.msra.gmra.mxu0 %v7390_v16  ;;  %6027 = vmatpush3.msra.mxu1 %v4281_v11 }
 0x3dd   : > { %6013 = vmatmul.mubr.f32.gmra.mxu1 %v7422_v0  ;;  %5990 = vmatprep.mubr.f32.mxu0 %v7387_v33 }
 0x3de   : > { %6016 = vmatpush3.msra.mxu0 %v7474_v48  ;;  %6048 = vmatprep.subr.mxu1 %v7474_v48 }
 0x3df   : > { %6037 = vmatprep.subr.mxu0 %v7478_v31 }
 0x3e0   : > { %5991 = vmatmul.mubr.f32.gmra.mxu0 %v7405_v47 }
 0x3e1   : > { %5993 = vmatprep.mubr.f32.mxu0 %v7410_v30 }
 0x3e4   : > { %5994 = vmatmul.mubr.f32.gmra.mxu0 %v7422_v0 }
 0x477   : > { %v5932_v40 = vpop.f32.mrf.mxu1 }
 0x479   : > { %v3604_v42 = vpop.f32.mrf.mxu1 }
 0x47b   : > { %v5935_v6 = vpop.f32.mrf.mxu1 }
 0x47d   : > { %v3616_v28 = vpop.f32.mrf.mxu1 }
 0x47f   : > { %v5913_v43 = vpop.f32.mrf.mxu0 }
 0x480   : > { %v5938_v3 = vpop.f32.mrf.mxu1  ;;  %v3611_v44 = vadd.f32 %v5932_v40, %v5913_v43 }
 0x481   : > { %v3458_v53 = vpop.f32.mrf.mxu0 }
 0x482   : > { %v3628_v5 = vpop.f32.mrf.mxu1  ;;  %v3605_v36 = vadd.f32 %v3604_v42, %v3458_v53 }
 0x484   : > { %v5916_v57 = vpop.f32.mrf.mxu0 }
 0x485   : > { %v5970_v10 = vpop.f32.mrf.mxu1  ;;  %v3623_v49 = vadd.f32 %v5935_v6, %v5916_v57 }
 0x486   : > { %v3478_v58 = vpop.f32.mrf.mxu0 }
 0x487   : > { %v3829_v27 = vpop.f32.mrf.mxu1  ;;  %v3617_v47 = vadd.f32 %v3616_v28, %v3478_v58 }
 0x48a   : > { %v5919_v52 = vpop.f32.mrf.mxu0 }
 0x48b   : > { %v5973_v32 = vpop.f32.mrf.mxu1  ;;  %v3635_v9 = vadd.f32 %v5938_v3, %v5919_v52 }
 0x48c   : > { %v3498_v13 = vpop.f32.mrf.mxu0 }
 0x48d   : > { %v3845_v50 = vpop.f32.mrf.mxu1  ;;  %v3629_v59 = vadd.f32 %v3628_v5, %v3498_v13 }
 0x48e   : > { %v5951_v33 = vpop.f32.mrf.mxu0 }
 0x48f   : > { %v3724_v17 = vadd.f32 %v5951_v33, %v3611_v44 }
 0x490   : > { %v5976_v4 = vpop.f32.mrf.mxu1  ;;  %v3716_v18 = vpop.f32.mrf.mxu0 }
 0x491   : > { %v3717_v63 = vadd.f32 %v3716_v18, %v3605_v36  ;;  %v3838_v30 = vadd.f32 %v5970_v10, %v3724_v17 }
 0x492   : > { %v3861_v16 = vpop.f32.mrf.mxu1 }
 0x493   : > { %v3830_v26 = vadd.f32 %v3829_v27, %v3717_v63 }
 0x494   : > { %v5954_v34 = vpop.f32.mrf.mxu0 }
 0x495   : > { %v6008_v24 = vpop.f32.mrf.mxu1  ;;  %v3738_v21 = vadd.f32 %v5954_v34, %v3623_v49 }
 0x496   : > { %v3730_v2 = vpop.f32.mrf.mxu0 }
 0x497   : > { %v4061_v29 = vpop.f32.mrf.mxu1  ;;  %v3731_v38 = vadd.f32 %v3730_v2, %v3617_v47  ;;  %v3854_v35 = vadd.f32 %v5973_v32, %v3738_v21 }
 0x498   : > { %v5957_v56 = vpop.f32.mrf.mxu0 }
 0x499   : > { %v6011_v8 = vpop.f32.mrf.mxu1  ;;  %v3752_v37 = vadd.f32 %v5957_v56, %v3635_v9  ;;  %v3846_v62 = vadd.f32 %v3845_v50, %v3731_v38 }
 0x49a   : > { %v3744_v1 = vpop.f32.mrf.mxu0 }
 0x49b   : > { %v4073_v41 = vpop.f32.mrf.mxu1  ;;  %v3745_v39 = vadd.f32 %v3744_v1, %v3629_v59  ;;  %v3870_v6 = vadd.f32 %v5976_v4, %v3752_v37 }
 0x49c   : > { %v5989_v51 = vpop.f32.mrf.mxu0 }
 0x49d   : > { %v3962_v25 = vadd.f32 %v5989_v51, %v3838_v30  ;;  %v6014_v43 = vpop.f32.mrf.mxu1  ;;  %v3862_v58 = vadd.f32 %v3861_v16, %v3745_v39 }
 0x49e   : > { %v3955_v0 = vpop.f32.mrf.mxu0 }
 0x49f   : > { %v4068_v23 = vadd.f32 %v6008_v24, %v3962_v25  ;;  %v3956_v12 = vadd.f32 %v3955_v0, %v3830_v26  ;;  %v4085_v18 = vpop.f32.mrf.mxu1 }
 0x4a0   : > { %v5992_v46 = vpop.f32.mrf.mxu0 }
 0x4a1   : > { %v4106_v54 = vsel %vm2544_vm4, %v4068_v23, 0  ;;  %v4062_v55 = vadd.f32 %v4061_v29, %v3956_v12  ;;  %v3974_v22 = vadd.f32 %v5992_v46, %v3854_v35 }
 0x4a2   : > { %v7489_v61 = vand.u32 4294901760, %v4106_v54  ;;  %v3967_v7 = vpop.f32.mrf.mxu0 }
 0x4a3   : > { %v4103_v11 = vsel %vm2544_vm4, %v4062_v55, 0  ;;  %v4080_v40 = vadd.f32 %v6011_v8, %v3974_v22  ;;  %v3968_v42 = vadd.f32 %v3967_v7, %v3846_v62 }
 0x4a4   : > { %v7493_v28 = vsub.f32 %v4106_v54, %v7489_v61  ;;  %v7495_v3 = vand.u32 4294901760, %v4103_v11  ;;  %v5995_v53 = vpop.f32.mrf.mxu0 }
 0x4a5   : > { %v4112_v5 = vsel %vm2544_vm4, %v4080_v40, 0  ;;  %v4074_v57 = vadd.f32 %v4073_v41, %v3968_v42  ;;  %v3986_v10 = vadd.f32 %v5995_v53, %v3870_v6 }
 0x4a6   : > { %v4198_v27 = vand.u32 4294901760, %v7493_v28  ;;  %v4187_v52 = vsub.f32 %v4103_v11, %v7495_v3  ;;  %v7500_v32 = vand.u32 4294901760, %v4112_v5  ;;  %v3979_v13 = vpop.f32.mrf.mxu0  ;;  %6028 = vmatprep.mubr.f32.mxu1 %v7495_v3 }
 0x4a7   : > { %v4109_v50 = vsel %vm2544_vm4, %v4074_v57, 0  ;;  %v4092_v33 = vadd.f32 %v6014_v43, %v3986_v10  ;;  %v3980_v4 = vadd.f32 %v3979_v13, %v3862_v58  ;;  %6029 = vmatmul.mubr.f32.vlgmr.msra.gmra.mxu1 %v7489_v61 }
 0x4a8   : > { %v4217_v34 = vsub.f32 %v4112_v5, %v7500_v32  ;;  %v4206_v44 = vand.u32 4294901760, %v4109_v50  ;;  %v4188_v16 = vand.u32 4294901760, %v4187_v52  ;;  %6049 = vmatpush3.msra.mxu1 %v7474_v48  ;;  %v4199_v24 = vsub.f32 %v7493_v28, %v4198_v27 }
 0x4a9   : > { %v4118_v2 = vsel %vm2544_vm4, %v4092_v33, 0  ;;  %v4086_v36 = vadd.f32 %v4085_v18, %v3980_v4  ;;  %6070 = vmatprep.subr.mxu1 %v7474_v48 }
 0x4aa   : > { %v4207_v17 = vsub.f32 %v4109_v50, %v4206_v44  ;;  %v4236_v29 = vand.u32 4294901760, %v4118_v2  ;;  %6031 = vmatprep.mubr.f32.mxu1 %v4206_v44  ;;  %v4189_v56 = vsub.f32 %v4187_v52, %v4188_v16  ;;  %v4218_v63 = vand.u32 4294901760, %v4217_v34 }
 0x4ab   : > { %v4115_v49 = vsel %vm2544_vm4, %v4086_v36, 0  ;;  %6032 = vmatmul.mubr.f32.gmra.mxu1 %v7500_v32  ;;  %v4200_v38 = vand.u32 4294901760, %v4199_v24 }
 0x4ac   : > { %v4237_v47 = vsub.f32 %v4118_v2, %v4236_v29  ;;  %v4226_v1 = vand.u32 4294901760, %v4115_v49  ;;  %v4190_v21 = vand.u32 4294901760, %v4189_v56  ;;  %v4208_v30 = vand.u32 4294901760, %v4207_v17 }
 0x4ad   : > { %v4219_v8 = vsub.f32 %v4217_v34, %v4218_v63 }
 0x4ae   : > { %v4227_v51 = vsub.f32 %v4115_v49, %v4226_v1  ;;  %6017 = vmatprep.mubr.f32.mxu0 %v4190_v21  ;;  %6034 = vmatprep.mubr.f32.mxu1 %v4226_v1  ;;  %v4209_v9 = vsub.f32 %v4207_v17, %v4208_v30  ;;  %v4238_v25 = vand.u32 4294901760, %v4237_v47  ;;  %v4096_v49 = vld [vmem:[#allocation2 + $0x8] sm:$0xff] }
 0x4af   : > { %6018 = vmatmul.mubr.f32.vlgmr.msra.gmra.mxu0 %v4200_v38  ;;  %6035 = vmatmul.mubr.f32.gmra.mxu1 %v4236_v29  ;;  %v4220_v0 = vand.u32 4294901760, %v4219_v8  ;;  %v4095_v8 = vld [vmem:[#allocation2] sm:$0xff] }
 0x4b0   : > { %6038 = vmatpush3.msra.mxu0 %v7478_v31  ;;  %6050 = vmatprep.mubr.f32.mxu1 %v4188_v16  ;;  %v4210_v26 = vand.u32 4294901760, %v4209_v9  ;;  %v4228_v59 = vand.u32 4294901760, %v4227_v51  ;;  %v4239_v37 = vsub.f32 %v4237_v47, %v4238_v25 }
 0x4b1   : > { %6059 = vmatprep.subr.mxu0 %v7482_v60 }
 0x4b2   : > { %6020 = vmatprep.mubr.f32.mxu0 %v4210_v26  ;;  %v4229_v23 = vsub.f32 %v4227_v51, %v4228_v59  ;;  %v4240_v35 = vand.u32 4294901760, %v4239_v37  ;;  %v4098_v37 = vld [vmem:[#allocation2 + $0x18] sm:$0xff] }
 0x4b3   : > { %6021 = vmatmul.mubr.f32.gmra.mxu0 %v4220_v0  ;;  %6051 = vmatmul.mubr.f32.vlgmr.msra.gmra.mxu1 %v4198_v27 }
 0x4b4   : > { %6053 = vmatprep.mubr.f32.mxu1 %v4208_v30  ;;  %v4230_v12 = vand.u32 4294901760, %v4229_v23  ;;  %6071 = vmatpush3.msra.mxu1 %v7474_v48 }
 0x4b6   : > { %6023 = vmatprep.mubr.f32.mxu0 %v4230_v12 }
 0x4b7   : > { %6024 = vmatmul.mubr.f32.gmra.mxu0 %v4240_v35  ;;  %6054 = vmatmul.mubr.f32.gmra.mxu1 %v4218_v63 }
 0x4b8   : > { %6039 = vmatprep.mubr.f32.mxu0 %v4187_v52  ;;  %6056 = vmatprep.mubr.f32.mxu1 %v4228_v59 }
 0x4bb   : > { %6040 = vmatmul.mubr.f32.vlgmr.msra.gmra.mxu0 %v7493_v28  ;;  %6057 = vmatmul.mubr.f32.gmra.mxu1 %v4238_v25 }
 0x4bc   : > { %6042 = vmatprep.mubr.f32.mxu0 %v4207_v17  ;;  %6060 = vmatpush3.msra.mxu0 %v7482_v60 }
 0x4bd   : > { %6072 = vmatprep.mubr.f32.mxu1 %v7495_v3 }
 0x4bf   : > { %6043 = vmatmul.mubr.f32.gmra.mxu0 %v4217_v34  ;;  %6073 = vmatmul.mubr.f32.vlgmr.msra.gmra.mxu1 %v7489_v61 }
 0x4c0   : > { %6045 = vmatprep.mubr.f32.mxu0 %v4227_v51  ;;  %6075 = vmatprep.mubr.f32.mxu1 %v4206_v44 }
 0x4c3   : > { %6046 = vmatmul.mubr.f32.gmra.mxu0 %v4237_v47  ;;  %6076 = vmatmul.mubr.f32.gmra.mxu1 %v7500_v32 }
 0x4c4   : > { %6061 = vmatprep.mubr.f32.mxu0 %v7495_v3  ;;  %6078 = vmatprep.mubr.f32.mxu1 %v4226_v1 }
 0x4c7   : > { %6062 = vmatmul.mubr.f32.vlgmr.msra.gmra.mxu0 %v7489_v61  ;;  %6079 = vmatmul.mubr.f32.gmra.mxu1 %v4236_v29 }
 0x4c8   : > { %6064 = vmatprep.mubr.f32.mxu0 %v4206_v44 }
 0x4cb   : > { %6065 = vmatmul.mubr.f32.gmra.mxu0 %v7500_v32 }
 0x4cc   : > { %6067 = vmatprep.mubr.f32.mxu0 %v4226_v1 }
 0x4cf   : > { %6068 = vmatmul.mubr.f32.gmra.mxu0 %v4236_v29 }
 0x567   : > { %v6030_v48 = vpop.f32.mrf.mxu1 }
 0x569   : > { %v4318_v31 = vpop.f32.mrf.mxu1 }
 0x56b   : > { %v6033_v60 = vpop.f32.mrf.mxu1 }
 0x56d   : > { %v4330_v41 = vpop.f32.mrf.mxu1 }
 0x56f   : > { %v6019_v46 = vpop.f32.mrf.mxu0  ;;  %v6036_v62 = vpop.f32.mrf.mxu1 }
 0x570   : > { %v4325_v10 = vadd.f32 %v6030_v48, %v6019_v46 }
 0x571   : > { %v4192_v39 = vpop.f32.mrf.mxu0  ;;  %v4342_v54 = vpop.f32.mrf.mxu1 }
 0x572   : > { %v4319_v27 = vadd.f32 %v4318_v31, %v4192_v39 }
 0x573   : > { %v6022_v55 = vpop.f32.mrf.mxu0  ;;  %v6052_v22 = vpop.f32.mrf.mxu1 }
 0x574   : > { %v4337_v50 = vadd.f32 %v6033_v60, %v6022_v55 }
 0x575   : > { %v4212_v7 = vpop.f32.mrf.mxu0  ;;  %v4531_v11 = vpop.f32.mrf.mxu1 }
 0x576   : > { %v4331_v4 = vadd.f32 %v4330_v41, %v4212_v7  ;;  %v4097_v41 = vld [vmem:[#allocation2 + $0x10] sm:$0xff] }
 0x577   : > { %v6025_v40 = vpop.f32.mrf.mxu0  ;;  %v6055_v61 = vpop.f32.mrf.mxu1 }
 0x578   : > { %v4349_v36 = vadd.f32 %v6036_v62, %v6025_v40 }
 0x579   : > { %v4232_v42 = vpop.f32.mrf.mxu0  ;;  %v4547_v6 = vpop.f32.mrf.mxu1 }
 0x57a   : > { %v4343_v56 = vadd.f32 %v4342_v54, %v4232_v42 }
 0x57b   : > { %v6041_v28 = vpop.f32.mrf.mxu0  ;;  %v6058_v43 = vpop.f32.mrf.mxu1 }
 0x57c   : > { %v4430_v52 = vadd.f32 %v6041_v28, %v4325_v10 }
 0x57d   : > { %v4422_v3 = vpop.f32.mrf.mxu0  ;;  %v4563_v53 = vpop.f32.mrf.mxu1 }
 0x57e   : > { %v4423_v33 = vadd.f32 %v4422_v3, %v4319_v27  ;;  %v4540_v44 = vadd.f32 %v6052_v22, %v4430_v52  ;;  %v4100_v22 = vld [vmem:[#allocation2 + $0x28] sm:$0xff] }
 0x57f   : > { %v6044_v5 = vpop.f32.mrf.mxu0  ;;  %v6074_v57 = vpop.f32.mrf.mxu1 }
 0x580   : > { %v4444_v34 = vadd.f32 %v6044_v5, %v4337_v50  ;;  %v4532_v29 = vadd.f32 %v4531_v11, %v4423_v33 }
 0x581   : > { %v4436_v58 = vpop.f32.mrf.mxu0  ;;  %v4747_v32 = vpop.f32.mrf.mxu1 }
 0x582   : > { %v4437_v16 = vadd.f32 %v4436_v58, %v4331_v4  ;;  %v4556_v30 = vadd.f32 %v6055_v61, %v4444_v34 }
 0x583   : > { %v6047_v13 = vpop.f32.mrf.mxu0  ;;  %v6077_v24 = vpop.f32.mrf.mxu1 }
 0x584   : > { %v4458_v47 = vadd.f32 %v6047_v13, %v4349_v36  ;;  %v4548_v9 = vadd.f32 %v4547_v6, %v4437_v16  ;;  %v4099_v6 = vld [vmem:[#allocation2 + $0x20] sm:$0xff] }
 0x585   : > { %v4450_v18 = vpop.f32.mrf.mxu0  ;;  %v4759_v38 = vpop.f32.mrf.mxu1 }
 0x586   : > { %v4451_v25 = vadd.f32 %v4450_v18, %v4343_v56  ;;  %v4572_v31 = vadd.f32 %v6058_v43, %v4458_v47 }
 0x587   : > { %v6063_v2 = vpop.f32.mrf.mxu0  ;;  %v6080_v60 = vpop.f32.mrf.mxu1 }
 0x588   : > { %v4652_v17 = vadd.f32 %v6063_v2, %v4540_v44  ;;  %v4564_v55 = vadd.f32 %v4563_v53, %v4451_v25 }
 0x589   : > { %v4645_v63 = vpop.f32.mrf.mxu0  ;;  %v4771_v42 = vpop.f32.mrf.mxu1 }
 0x58a   : > { %v4754_v1 = vadd.f32 %v6074_v57, %v4652_v17  ;;  %v4646_v21 = vadd.f32 %v4645_v63, %v4532_v29 }
 0x58b   : > { %v6066_v51 = vpop.f32.mrf.mxu0 }
 0x58c   : > { %v4782_v26 = vadd.f32 %v4754_v1, %v4096_v49  ;;  %v4748_v59 = vadd.f32 %v4747_v32, %v4646_v21  ;;  %v4664_v0 = vadd.f32 %v6066_v51, %v4556_v30 }
 0x58d   : > { %v4657_v23 = vpop.f32.mrf.mxu0 }
 0x58e   : > { %4788 = vst.msk [vmem:[#allocation2 + $0x8] sm:$0xff] %vm488_vm2, %v4782_v26  ;;  %v4781_v12 = vadd.f32 %v4748_v59, %v4095_v8  ;;  %v4766_v35 = vadd.f32 %v6077_v24, %v4664_v0  ;;  %v4658_v48 = vadd.f32 %v4657_v23, %v4548_v9 }
 0x58f   : > { %v6069_v46 = vpop.f32.mrf.mxu0 }
 0x590   : > { %4787 = vst.msk [vmem:[#allocation2] sm:$0xff] %vm488_vm2, %v4781_v12  ;;  %v4784_v62 = vadd.f32 %v4766_v35, %v4098_v37  ;;  %v4760_v39 = vadd.f32 %v4759_v38, %v4658_v48  ;;  %v4676_v54 = vadd.f32 %v6069_v46, %v4572_v31 }
 0x591   : > { %v4669_v7 = vpop.f32.mrf.mxu0 }
 0x592   : > { %4790 = vst.msk [vmem:[#allocation2 + $0x18] sm:$0xff] %vm488_vm2, %v4784_v62  ;;  %v4783_v11 = vadd.f32 %v4760_v39, %v4097_v41  ;;  %v4778_v40 = vadd.f32 %v6080_v60, %v4676_v54  ;;  %v4670_v61 = vadd.f32 %v4669_v7, %v4564_v55 }
 0x594   : > { %4789 = vst.msk [vmem:[#allocation2 + $0x10] sm:$0xff] %vm488_vm2, %v4783_v11  ;;  %v4786_v28 = vadd.f32 %v4778_v40, %v4100_v22  ;;  %v4772_v43 = vadd.f32 %v4771_v42, %v4670_v61  ;;  %4796 = sbr.rel (%p5062_p11) target bundleno = 1757 (0x6dd), region = 64 }
 0x596   : > { %4792 = vst.msk [vmem:[#allocation2 + $0x28] sm:$0xff] %vm488_vm2, %v4786_v28  ;;  %v4785_v3 = vadd.f32 %v4772_v43, %v4099_v6 }
 0x598   : > { %4791 = vst.msk [vmem:[#allocation2 + $0x20] sm:$0xff] %vm488_vm2, %v4785_v3 }
 0x599   : > { %v4797_v53 = vld [vmem:[#allocation2] sm:$0xff]  ;;  %v4798_v57 = vld [vmem:[#allocation2 + $0x8] sm:$0xff]  ;;  %v4800_v52 = vld [vmem:[#allocation2 + $0x18] sm:$0xff] }
 0x59a   : > { %v4803_v10 = vadd.f32 %v4797_v53, %v6374_v14  ;;  %v4804_v27 = vadd.f32 %v4798_v57, %v6379_v15  ;;  %v4806_v32 = vadd.f32 %v4800_v52, %v6395_v20  ;;  %v5064_v52 = vld [vmem:[%s443_s21] ss:$0 sm:$0xff] }
 0x59b   : > { %v4799_v5 = vld [vmem:[#allocation2 + $0x10] sm:$0xff] }
 0x59c   : > { %v4805_v58 = vadd.f32 %v4799_v5, %v6390_v19  ;;  %v4809_v33 = vsel %vm488_vm2, %v4803_v10, 0.0  ;;  %v4812_v18 = vsel %vm488_vm2, %v4804_v27, 0.0  ;;  %v4818_v34 = vsel %vm488_vm2, %v4806_v32, 0.0  ;;  %v7628_v19 = vld [vmem:[#allocation7_spill] sm:$0xff] }
 0x59d   : > { %v4802_v50 = vld [vmem:[#allocation2 + $0x28] sm:$0xff]  ;;  %4810 = vadd.xlane.f32.xlu0 %v4809_v33 }
 0x59e   : > { %v4815_v4 = vsel %vm488_vm2, %v4805_v58, 0.0  ;;  %v4808_v44 = vadd.f32 %v4802_v50, %v7628_v19 }
 0x59f   : > { %v4801_v13 = vld [vmem:[#allocation2 + $0x20] sm:$0xff]  ;;  %4816 = vadd.xlane.f32.xlu1 %v4815_v4 }
 0x5a0   : > { %v4807_v14 = vadd.f32 %v4801_v13, %v6461_v45  ;;  %v4824_v20 = vsel %vm488_vm2, %v4808_v44, 0.0 }
 0x5a1   : > { %4813 = vadd.xlane.f32.xlu0 %v4812_v18 }
 0x5a2   : > { %v4821_v15 = vsel %vm488_vm2, %v4807_v14, 0.0 }
 0x5a3   : > { %4819 = vadd.xlane.f32.xlu1 %v4818_v34 }
 0x5a5   : > { %4822 = vadd.xlane.f32.xlu0 %v4821_v15 }
 0x5a7   : > { %4825 = vadd.xlane.f32.xlu1 %v4824_v20 }
 0x626   : > { %v4811_v16 = vpop.xlane.xlu0 %4810 }
 0x627   : > { %v4828_v2 = vmul.f32 0.03125, %v4811_v16 }
 0x628   : > { %v4817_v24 = vpop.xlane.xlu1 %4816 }
 0x629   : > { %v4830_v36 = vmul.f32 0.03125, %v4817_v24  ;;  %v4834_v17 = vsub.f32 %v4803_v10, %v4828_v2 }
 0x62a   : > { %v4814_v56 = vpop.xlane.xlu0 %4813 }
 0x62b   : > { %v7542_v29 = vsub.f32 %v4805_v58, %v4830_v36  ;;  %v4829_v45 = vmul.f32 0.03125, %v4814_v56  ;;  %v4840_v47 = vmul.f32 %v4834_v17, %v4834_v17  ;;  %v5063_v58 = vld [vmem:[%s440_s17] ss:$0 sm:$0xff] }
 0x62c   : > { %v4820_v49 = vpop.xlane.xlu1 %4819 }
 0x62d   : > { %v4831_v63 = vmul.f32 0.03125, %v4820_v49  ;;  %v4842_v1 = vmul.f32 %v7542_v29, %v7542_v29  ;;  %v4835_v21 = vsub.f32 %v4804_v27, %v4829_v45  ;;  %v4846_v38 = vsel %vm488_vm2, %v4840_v47, 0.0 }
 0x62e   : > { %4847 = vadd.xlane.f32.xlu0 %v4846_v38  ;;  %v4823_v8 = vpop.xlane.xlu0 %4822 }
 0x62f   : > { %v7546_v30 = vsub.f32 %v4806_v32, %v4831_v63  ;;  %v4852_v9 = vsel %vm488_vm2, %v4842_v1, 0.0  ;;  %v4832_v25 = vmul.f32 0.03125, %v4823_v8  ;;  %v4841_v59 = vmul.f32 %v4835_v21, %v4835_v21 }
 0x630   : > { %v4826_v51 = vpop.xlane.xlu1 %4825 }
 0x631   : > { %v4833_v26 = vmul.f32 0.03125, %v4826_v51  ;;  %v4843_v0 = vmul.f32 %v7546_v30, %v7546_v30  ;;  %v4838_v37 = vsub.f32 %v4807_v14, %v4832_v25  ;;  %v4849_v12 = vsel %vm488_vm2, %v4841_v59, 0.0 }
 0x632   : > { %4853 = vadd.xlane.f32.xlu0 %v4852_v9  ;;  %4850 = vadd.xlane.f32.xlu1 %v4849_v12 }
 0x633   : > { %v4839_v23 = vsub.f32 %v4808_v44, %v4833_v26  ;;  %v4855_v35 = vsel %vm488_vm2, %v4843_v0, 0.0  ;;  %v4844_v48 = vmul.f32 %v4838_v37, %v4838_v37 }
 0x635   : > { %v4845_v31 = vmul.f32 %v4839_v23, %v4839_v23  ;;  %v4858_v60 = vsel %vm488_vm2, %v4844_v48, 0.0 }
 0x636   : > { %4856 = vadd.xlane.f32.xlu1 %v4855_v35  ;;  %4859 = vadd.xlane.f32.xlu0 %v4858_v60 }
 0x637   : > { %v4861_v41 = vsel %vm488_vm2, %v4845_v31, 0.0 }
 0x63a   : > { %4862 = vadd.xlane.f32.xlu1 %v4861_v41 }
 0x6b7   : > { %v4848_v46 = vpop.xlane.xlu0 %4847 }
 0x6b8   : > { %v4864_v62 = vmul.f32 0.03125, %v4848_v46 }
 0x6ba   : > { %v4870_v39 = vadd.f32 1e-05, %v4864_v62 }
 0x6bb   : > { %v4851_v54 = vpop.xlane.xlu1 %4850  ;;  %v4854_v55 = vpop.xlane.xlu0 %4853 }
 0x6bc   : > { %6148 = vrsqrt.f32 %v4870_v39  ;;  %v4865_v22 = vmul.f32 0.03125, %v4851_v54  ;;  %v4866_v7 = vmul.f32 0.03125, %v4854_v55 }
 0x6be   : > { %v4871_v11 = vadd.f32 1e-05, %v4865_v22  ;;  %v4872_v40 = vadd.f32 1e-05, %v4866_v7 }
 0x6bf   : > { %v4857_v61 = vpop.xlane.xlu1 %4856  ;;  %v4860_v42 = vpop.xlane.xlu0 %4859 }
 0x6c0   : > { %6150 = vrsqrt.f32 %v4871_v11  ;;  %v4867_v6 = vmul.f32 0.03125, %v4857_v61  ;;  %v4868_v28 = vmul.f32 0.03125, %v4860_v42 }
 0x6c1   : > { %6152 = vrsqrt.f32 %v4872_v40 }
 0x6c2   : > { %v4873_v43 = vadd.f32 1e-05, %v4867_v6  ;;  %v4874_v3 = vadd.f32 1e-05, %v4868_v28 }
 0x6c3   : > { %v4863_v53 = vpop.xlane.xlu1 %4862 }
 0x6c4   : > { %6154 = vrsqrt.f32 %v4873_v43  ;;  %v4869_v5 = vmul.f32 0.03125, %v4863_v53 }
 0x6c5   : > { %6156 = vrsqrt.f32 %v4874_v3 }
 0x6c6   : > { %v4875_v57 = vadd.f32 1e-05, %v4869_v5 }
 0x6c8   : > { %6158 = vrsqrt.f32 %v4875_v57 }
 0x6c9   : > { %v6149_v10 = vpop.eup %6148 }
 0x6ca   : > { %v4882_v27 = vmul.f32 %v6149_v10, %v4834_v17 }
 0x6cc   : > { %v4895_v32 = vmul.f32 %v5063_v58, %v4882_v27 }
 0x6cd   : > { %v6151_v13 = vpop.eup %6150 }
 0x6ce   : > { %v6153_v50 = vpop.eup %6152  ;;  %v4908_v33 = vadd.f32 %v5064_v52, %v4895_v32  ;;  %v4883_v4 = vmul.f32 %v6151_v13, %v4835_v21 }
 0x6cf   : > { %v4884_v18 = vmul.f32 %v6153_v50, %v7542_v29 }
 0x6d0   : > { %4914 = vst.msk [vmem:[%s7615_s8] sm:$0xff] %vm488_vm2, %v4908_v33  ;;  %v4896_v34 = vmul.f32 %v5063_v58, %v4883_v4 }
 0x6d1   : > { %v6155_v14 = vpop.eup %6154  ;;  %v4897_v19 = vmul.f32 %v5063_v58, %v4884_v18 }
 0x6d2   : > { %v6157_v44 = vpop.eup %6156  ;;  %v4909_v15 = vadd.f32 %v5064_v52, %v4896_v34  ;;  %v4885_v20 = vmul.f32 %v6155_v14, %v7546_v30 }
 0x6d3   : > { %v4910_v16 = vadd.f32 %v5064_v52, %v4897_v19  ;;  %v4886_v24 = vmul.f32 %v6157_v44, %v4838_v37 }
 0x6d4   : > { %4915 = vst.msk [vmem:[%s7615_s8 + $0x8] sm:$0xff] %vm488_vm2, %v4909_v15  ;;  %v4898_v2 = vmul.f32 %v5063_v58, %v4885_v20 }
 0x6d5   : > { %v6159_v36 = vpop.eup %6158  ;;  %4916 = vst.msk [vmem:[%s7615_s8 + $0x10] sm:$0xff] %vm488_vm2, %v4910_v16  ;;  %v4899_v17 = vmul.f32 %v5063_v58, %v4886_v24 }
 0x6d6   : > { %v4911_v29 = vadd.f32 %v5064_v52, %v4898_v2  ;;  %v4887_v56 = vmul.f32 %v6159_v36, %v4839_v23 }
 0x6d7   : > { %v4912_v49 = vadd.f32 %v5064_v52, %v4899_v17 }
 0x6d8   : > { %4917 = vst.msk [vmem:[%s7615_s8 + $0x18] sm:$0xff] %vm488_vm2, %v4911_v29  ;;  %v4900_v45 = vmul.f32 %v5063_v58, %v4887_v56 }
 0x6d9   : > { %4918 = vst.msk [vmem:[%s7615_s8 + $0x20] sm:$0xff] %vm488_vm2, %v4912_v49 }
 0x6da   : > { %v4913_v63 = vadd.f32 %v5064_v52, %v4900_v45 }
 0x6dc   : > { %4919 = vst.msk [vmem:[%s7615_s8 + $0x28] sm:$0xff] %vm488_vm2, %v4913_v63 }
 0x6dd PF: > { %s18_s9 = sadd.s32 1, %s6198_s9   ;;  %s7629_s27 = sld [smem:[#allocation3_spill]] }
 0x6de   : > { %p15_p12 = scmp.ge.s32.totalorder %s18_s9, 10   ;;  %s7630_s28 = sld [smem:[#allocation4_spill]] }
 0x6df   : > { %s7631_s29 = sld [smem:[#allocation5_spill]] }
 0x6e0   : > { %s7632_s30 = sld [smem:[#allocation6_spill]]  ;;  %17 = sbr.rel (!%p15_p12) target bundleno = 3 (0x3), region = 105 }

</bundles_post_ra>
